<compile_context>
chip_gen: v7x
topology: tpu7x:2x2x1
jax: 0.10.0
libtpu: 0.0.40
codegen_flags: <defaults>
</compile_context>

<pallas_src>
import functools

import jax
import jax.numpy as jnp
from jax import lax
from jax.experimental import pallas as pl
from jax.experimental.pallas import tpu as pltpu


def _round_up(x, m):
    return ((x + m - 1) // m) * m


@functools.lru_cache(maxsize=None)
def _vmem_limit_bytes():
    """Generation-aware scoped-VMEM budget: ~75% of physical, capped at 100 MiB."""
    cap = 128 * 1024 * 1024
    try:
        cap = int(pltpu.get_tpu_info().vmem_capacity_bytes)
    except Exception:
        pass
    return int(min(cap * 3 // 4, 100 * 1024 * 1024))


@functools.lru_cache(maxsize=None)
def _num_parallel_bands():
    """2 on multi-TensorCore chips (v4 / v5p megacore, v7x); 1 on v5e / v6e."""
    try:
        kind = jax.devices()[0].device_kind.lower()
    except Exception:
        return 1
    if "lite" in kind or "v5e" in kind or "v6e" in kind or "v6" in kind:
        return 1
    if "v7" in kind or "v4" in kind or "v5p" in kind or kind.strip().endswith("v5"):
        return 2
    return 1


def _pick_tile_n(n, d, k, vmem_limit):
    """Largest 8-aligned row tile whose double-buffered tiles + temporaries fit VMEM."""
    # Per-row bytes: 2x double-buffered {x f32, dist f32, enc bf16, q f32, idx lane-padded}
    # plus a generous allowance for in-kernel (TILE_N, K)/(TILE_N, D) f32 temporaries.
    per_row = 2 * (4 * d + 4 * k + 2 * k + 4 * d + 4 * 128) + 4 * (4 * k + 4 * d)
    resident = 4 * 4 * d * k + 2 * 4 * 8 * _round_up(k, 128) + 4 * k + 4 * k * d
    budget = vmem_limit - resident - (8 << 20)      # headroom for Mosaic internals
    tile = max(budget // per_row, 8)
    tile = min(tile, 2048, _round_up(n, 8))
    return int(max(8, (tile // 8) * 8))


# ---------------------------------------------------------------------------
# Kernel 1: nearest-code assignment + grid-carried reductions (counts, dw).
# In eval mode (`fused=True`) it also quantizes and accumulates the sq-error,
# so the second kernel (and its extra HBM pass over x) is skipped entirely.
# ---------------------------------------------------------------------------
def _vq_assign_kernel(*refs, n_valid, tile_n, tiles_per_band, fused):
    if fused:
        (x_ref, et_ref, esq_ref, e_ref,
         dist_ref, enc_ref, idx_ref, counts_ref, q_ref, err_ref,
         counts_acc) = refs
    else:
        (x_ref, et_ref, esq_ref,
         dist_ref, enc_ref, idx_ref, counts_ref, dw_ref,
         counts_acc, dw_acc) = refs

    band = pl.program_id(0)
    step = pl.program_id(1)
    last = pl.num_programs(1) - 1

    @pl.when(step == 0)
    def _():
        counts_acc[...] = jnp.zeros_like(counts_acc)
        if not fused:
            dw_acc[...] = jnp.zeros_like(dw_acc)

    x = x_ref[...].astype(jnp.float32)                      # (TILE_N, D)
    e_t = et_ref[...].astype(jnp.float32)                   # (D, K), VMEM-resident
    num_codes = e_t.shape[1]

    # ||x||^2 - 2 x.E^T + ||E||^2; codebook pre-transposed in the wrapper so the
    # cross term is a natural (M,Kc)x(Kc,N) MXU matmul (no per-step transpose).
    x_sq = jnp.sum(x * x, axis=1, keepdims=True)            # (TILE_N, 1)
    cross = jnp.dot(x, e_t, preferred_element_type=jnp.float32)     # (TILE_N, K)
    d = x_sq - 2.0 * cross + esq_ref[...]
    dist_ref[...] = d.astype(dist_ref.dtype)

    # argmin with first-index tie-breaking (matches torch.argmin / jnp.argmin).
    min_d = jnp.min(d, axis=1, keepdims=True)
    col = lax.broadcasted_iota(jnp.int32, d.shape, 1)
    idx = jnp.min(jnp.where(d == min_d, col, num_codes), axis=1, keepdims=True)

    # Rows that only exist because N was padded to the tile grid get an
    # out-of-range index, so every downstream one-hot is identically zero.
    base = (band * tiles_per_band + step) * tile_n
    row = lax.broadcasted_iota(jnp.int32, (tile_n, 1), 0) + base
    valid = row < n_valid
    idx = jnp.where(valid, idx, num_codes)
    idx_ref[...] = idx

    onehot = (col == idx).astype(jnp.float32)               # (TILE_N, K)
    enc_ref[...] = onehot.astype(enc_ref.dtype)             # bf16 0/1 (exact): halves writes
    counts_acc[...] += jnp.sum(onehot, axis=0, keepdims=True)

    @pl.when(step == last)
    def _():
        counts_ref[...] = counts_acc[...] * jnp.ones((8, 1), jnp.float32)

    if fused:
        # Eval: codebook is not updated -> quantize in the same pass, skip dw.
        e = e_ref[...].astype(jnp.float32)                  # (K, D), VMEM-resident
        q = jnp.dot(onehot, e, preferred_element_type=jnp.float32)
        q_ref[...] = q.astype(q_ref.dtype)
        diff = jnp.where(valid, q - x, 0.0)
        err_ref[...] = jnp.sum(diff * diff, keepdims=True) * jnp.ones((8, 128), jnp.float32)
    else:
        # dw += one-hot^T @ x.
        # TODO(synk): if a bundle dump shows a per-step XLU transpose of the
        # (TILE_N, K) one-hot here, accumulate dw^T from a lane-oriented one-hot
        # instead and transpose the (K, D) result once in the wrapper.
        dw_acc[...] += lax.dot_general(onehot, x, (((0,), (0,)), ((), ())),
                                       preferred_element_type=jnp.float32)

        @pl.when(step == last)
        def _():
            dw_ref[...] = dw_acc[...]


# ---------------------------------------------------------------------------
# Kernel 2: EMA state update (training mode) + perplexity.  Tiny; single call.
# ---------------------------------------------------------------------------
def _vq_ema_update_kernel(counts_ref, dw_ref, cs_ref, ema_w_ref,
                          new_cs_ref, new_ema_w_ref, new_emb_ref, ppl_ref,
                          *, decay, epsilon, num_embeddings, n_valid):
    counts = counts_ref[...]                                 # (K, 1)
    cs = cs_ref[...] * decay + (1.0 - decay) * counts
    n_tot = jnp.sum(cs, keepdims=True)                       # (1, 1)
    cs = (cs + epsilon) / (n_tot + num_embeddings * epsilon) * n_tot
    ema_w = ema_w_ref[...] * decay + (1.0 - decay) * dw_ref[...]

    new_cs_ref[...] = cs
    new_ema_w_ref[...] = ema_w
    new_emb_ref[...] = ema_w / cs                            # (K, D) / (K, 1)

    avg_p = counts * (1.0 / float(n_valid))
    ent = jnp.sum(avg_p * jnp.log(avg_p + 1e-10), keepdims=True)   # (1, 1)
    ppl_ref[...] = jnp.exp(-ent)


# ---------------------------------------------------------------------------
# Kernel 3 (training only): quantize with the UPDATED codebook + per-tile
# squared-error partials written to private (8, 128) blocks (grid stays parallel).
# ---------------------------------------------------------------------------
def _vq_quantize_kernel(idx_ref, x_ref, e_ref, q_ref, err_ref, *, n_valid, tile_n):
    step = pl.program_id(0)
    e = e_ref[...].astype(jnp.float32)                       # (K, D), VMEM-resident
    idx = idx_ref[...]                                       # (TILE_N, 1) int32
    col = lax.broadcasted_iota(jnp.int32, (tile_n, e.shape[0]), 1)
    onehot = (col == idx).astype(jnp.float32)                # padded rows -> all-zero
    q = jnp.dot(onehot, e, preferred_element_type=jnp.float32)   # (TILE_N, D)
    q_ref[...] = q.astype(q_ref.dtype)

    x = x_ref[...].astype(jnp.float32)
    row = lax.broadcasted_iota(jnp.int32, (tile_n, 1), 0) + step * tile_n
    diff = jnp.where(row < n_valid, q - x, 0.0)
    err_ref[...] = jnp.sum(diff * diff, keepdims=True) * jnp.ones((8, 128), jnp.float32)


# ---------------------------------------------------------------------------
# Wrapper: full VectorQuantizerEMA forward.
# ---------------------------------------------------------------------------
@functools.partial(jax.jit,
                   static_argnames=("commitment_cost", "decay", "epsilon", "training"))
def vector_quantizer_ema_forward(inputs, embedding_weight, ema_cluster_size, ema_w,
                                 *, commitment_cost, decay, epsilon=1e-5,
                                 training=True):
    """Forward pass of VectorQuantizerEMA.

    inputs:            (B, D, T)   embedding_weight: (K, D)
    ema_cluster_size:  (K,)        ema_w:            (K, D)

    Returns (vq_loss, quantized (B,D,T), perplexity, encodings (B,T,K) [bf16 0/1],
             distances (B,T,K), encoding_indices (N,1),
             new_embedding_weight, new_ema_cluster_size, new_ema_w).
    EMA/codebook updates are returned functionally (no in-place Parameter mutation).
    """
    K, D = embedding_weight.shape

    # Literal port of `inputs.permute(1, 2, 0).contiguous().view(-1, D)`.
    x_perm = jnp.transpose(inputs, (1, 2, 0))                # (D, T, B)
    input_shape = x_perm.shape
    _, time_dim, batch_size = input_shape
    flat = x_perm.reshape(-1, D).astype(jnp.float32)         # (N, D)
    n = flat.shape[0]

    vmem_limit = _vmem_limit_bytes()
    tile_n = _pick_tile_n(n, D, K, vmem_limit)
    nc = _num_parallel_bands()
    if nc > 1 and (pl.cdiv(n, tile_n) < nc or K % 8 != 0):
        nc = 1                                               # not worth / not tileable
    n_pad = _round_up(n, nc * tile_n)
    num_tiles = n_pad // tile_n
    tiles_per_band = num_tiles // nc
    flat_p = jnp.pad(flat, ((0, n_pad - n), (0, 0))) if n_pad != n else flat

    emb = embedding_weight.astype(jnp.float32)               # (K, D)
    emb_t = jnp.transpose(emb)                               # (D, K) one-time transpose
    e_sq = jnp.sum(emb * emb, axis=1)[None, :]               # (1, K) grid-invariant

    row_map = lambda c, i: (c * tiles_per_band + i, 0)       # noqa: E731
    const2 = lambda c, i: (0, 0)                             # noqa: E731
    band_map = lambda c, i: (c, 0)                           # noqa: E731

    assign_params = pltpu.CompilerParams(
        dimension_semantics=("parallel", "arbitrary"),       # bands shard across TCs
        vmem_limit_bytes=vmem_limit)

    if training:
        dist_p, enc_p, idx_p, counts_parts, dw_parts = pl.pallas_call(
            functools.partial(_vq_assign_kernel, n_valid=n, tile_n=tile_n,
                              tiles_per_band=tiles_per_band, fused=False),
            grid=(nc, tiles_per_band),
            in_specs=[
                pl.BlockSpec((tile_n, D), row_map),          # x tile
                pl.BlockSpec((D, K), const2),                # codebook^T (resident)
                pl.BlockSpec((1, K), const2),                # |e|^2 (resident)
            ],
            out_specs=[
                pl.BlockSpec((tile_n, K), row_map),          # distances (f32)
                pl.BlockSpec((tile_n, K), row_map),          # one-hot (bf16)
                pl.BlockSpec((tile_n, 1), row_map),          # indices
                pl.BlockSpec((8, K), band_map),              # per-band counts
                pl.BlockSpec((K, D), band_map),              # per-band dw
            ],
            out_shape=[
                jax.ShapeDtypeStruct((n_pad, K), jnp.float32),
                jax.ShapeDtypeStruct((n_pad, K), jnp.bfloat16),
                jax.ShapeDtypeStruct((n_pad, 1), jnp.int32),
                jax.ShapeDtypeStruct((nc * 8, K), jnp.float32),
                jax.ShapeDtypeStruct((nc * K, D), jnp.float32),
            ],
            scratch_shapes=[pltpu.VMEM((1, K), jnp.float32),
                            pltpu.VMEM((K, D), jnp.float32)],
            compiler_params=assign_params,
        )(flat_p, emb_t, e_sq)

        counts_row = counts_parts.reshape(nc, 8, K)[:, 0, :]            # (nc, K)
        if nc > 1:
            counts_row = jnp.sum(counts_row, axis=0, keepdims=True)     # (1, K)
            dw = jnp.sum(dw_parts.reshape(nc, K, D), axis=0)            # (K, D)
        else:
            dw = dw_parts

        new_cs_col, new_ema_w, new_emb, ppl = pl.pallas_call(
            functools.partial(_vq_ema_update_kernel, decay=decay, epsilon=epsilon,
                              num_embeddings=K, n_valid=n),
            in_specs=[pl.BlockSpec(memory_space=pltpu.MemorySpace.VMEM)] * 4,
            out_specs=[pl.BlockSpec(memory_space=pltpu.MemorySpace.VMEM)] * 4,
            out_shape=[
                jax.ShapeDtypeStruct((K, 1), jnp.float32),
                jax.ShapeDtypeStruct((K, D), jnp.float32),
                jax.ShapeDtypeStruct((K, D), jnp.float32),
                jax.ShapeDtypeStruct((1, 1), jnp.float32),
            ],
        )(counts_row.reshape(K, 1), dw,
          ema_cluster_size.astype(jnp.float32).reshape(K, 1),
          ema_w.astype(jnp.float32))

        emb_q = new_emb                 # training quantizes with the UPDATED codebook
        new_cs = new_cs_col[:, 0]
        perplexity = ppl[0, 0]

        q_p, err_parts = pl.pallas_call(
            functools.partial(_vq_quantize_kernel, n_valid=n, tile_n=tile_n),
            grid=(num_tiles,),
            in_specs=[
                pl.BlockSpec((tile_n, 1), lambda i: (i, 0)),   # indices tile
                pl.BlockSpec((tile_n, D), lambda i: (i, 0)),   # x tile
                pl.BlockSpec((K, D), lambda i: (0, 0)),        # updated codebook
            ],
            out_specs=[
                pl.BlockSpec((tile_n, D), lambda i: (i, 0)),   # quantized tile
                pl.BlockSpec((8, 128), lambda i: (i, 0)),      # per-tile sq-err block
            ],
            out_shape=[
                jax.ShapeDtypeStruct((n_pad, D), jnp.float32),
                jax.ShapeDtypeStruct((num_tiles * 8, 128), jnp.float32),
            ],
            compiler_params=pltpu.CompilerParams(
                dimension_semantics=("parallel",),
                vmem_limit_bytes=vmem_limit),
        )(idx_p, flat_p, emb_q)
    else:
        # Eval mode: codebook unchanged -> fused assign+quantize, no dw, no 2nd pass.
        dist_p, enc_p, idx_p, counts_parts, q_p, err_parts = pl.pallas_call(
            functools.partial(_vq_assign_kernel, n_valid=n, tile_n=tile_n,
                              tiles_per_band=tiles_per_band, fused=True),
            grid=(nc, tiles_per_band),
            in_specs=[
                pl.BlockSpec((tile_n, D), row_map),
                pl.BlockSpec((D, K), const2),                # codebook^T (resident)
                pl.BlockSpec((1, K), const2),                # |e|^2 (resident)
                pl.BlockSpec((K, D), const2),                # codebook for quantize
            ],
            out_specs=[
                pl.BlockSpec((tile_n, K), row_map),
                pl.BlockSpec((tile_n, K), row_map),
                pl.BlockSpec((tile_n, 1), row_map),
                pl.BlockSpec((8, K), band_map),
                pl.BlockSpec((tile_n, D), row_map),
                pl.BlockSpec((8, 128), row_map),
            ],
            out_shape=[
                jax.ShapeDtypeStruct((n_pad, K), jnp.float32),
                jax.ShapeDtypeStruct((n_pad, K), jnp.bfloat16),
                jax.ShapeDtypeStruct((n_pad, 1), jnp.int32),
                jax.ShapeDtypeStruct((nc * 8, K), jnp.float32),
                jax.ShapeDtypeStruct((n_pad, D), jnp.float32),
                jax.ShapeDtypeStruct((num_tiles * 8, 128), jnp.float32),
            ],
            scratch_shapes=[pltpu.VMEM((1, K), jnp.float32)],
            compiler_params=assign_params,
        )(flat_p, emb_t, e_sq, emb)

        counts_row = counts_parts.reshape(nc, 8, K)[:, 0, :]
        if nc > 1:
            counts_row = jnp.sum(counts_row, axis=0, keepdims=True)
        new_emb = emb
        new_cs = ema_cluster_size
        new_ema_w = ema_w
        avg_p = counts_row[0] / n
        perplexity = jnp.exp(-jnp.sum(avg_p * jnp.log(avg_p + 1e-10)))
        # TODO(synk): eval-only pairwise diagnostics (encoding_distances,
        # embedding_distances, frames_vs_embedding_distances, concatenated_quantized)
        # are Python-loop / host-side diagnostics with no kernel equivalent.

    sq_err = jnp.sum(err_parts.reshape(num_tiles, 8, 128)[:, 0, 0])
    e_latent_loss = sq_err / jnp.float32(n * D)
    vq_loss = commitment_cost * e_latent_loss                 # commitment loss only

    quantized = q_p[:n].reshape(input_shape)
    # Straight-through estimator (value-identical in the forward pass).
    quantized = x_perm + lax.stop_gradient(quantized - x_perm)
    quantized_out = jnp.transpose(quantized, (2, 0, 1)).astype(inputs.dtype)

    encodings = enc_p[:n].reshape(batch_size, time_dim, K)    # bf16 0/1 (exact values)
    distances = dist_p[:n].reshape(batch_size, time_dim, K)
    encoding_indices = idx_p[:n]

    return (vq_loss, quantized_out, perplexity, encodings, distances,
            encoding_indices, new_emb, new_cs, new_ema_w)


# ---------------------------------------------------------------------------
# Pure-JAX reference (literal transcription of the PyTorch forward).
# ---------------------------------------------------------------------------
def _reference_forward(inputs, embedding_weight, ema_cluster_size, ema_w,
                       commitment_cost, decay, epsilon, training=True):
    K, D = embedding_weight.shape
    x_perm = jnp.transpose(inputs, (1, 2, 0))
    input_shape = x_perm.shape
    _, time_dim, batch_size = input_shape
    flat = x_perm.reshape(-1, D)
    d = (jnp.sum(flat ** 2, axis=1, keepdims=True)
         + jnp.sum(embedding_weight ** 2, axis=1)
         - 2.0 * flat @ embedding_weight.T)
    idx = jnp.argmin(d, axis=1)
    enc = jax.nn.one_hot(idx, K, dtype=jnp.float32)
    if training:
        cs = ema_cluster_size * decay + (1.0 - decay) * jnp.sum(enc, axis=0)
        n_tot = jnp.sum(cs)
        cs = (cs + epsilon) / (n_tot + K * epsilon) * n_tot
        dw = enc.T @ flat
        ema_w_new = ema_w * decay + (1.0 - decay) * dw
        emb_new = ema_w_new / cs[:, None]
    else:
        cs, ema_w_new, emb_new = ema_cluster_size, ema_w, embedding_weight
    q = (enc @ emb_new).reshape(input_shape)
    e_latent = jnp.mean((q - x_perm) ** 2)
    vq_loss = commitment_cost * e_latent
    avg_p = jnp.mean(enc, axis=0)
    ppl = jnp.exp(-jnp.sum(avg_p * jnp.log(avg_p + 1e-10)))
    q_out = jnp.transpose(q, (2, 0, 1))
    return (vq_loss, q_out, ppl, enc.reshape(batch_size, time_dim, K),
            d.reshape(batch_size, time_dim, K), idx.astype(jnp.int32),
            emb_new, cs, ema_w_new)


if __name__ == "__main__":
    key = jax.random.PRNGKey(0)
    k_emb, k_emaw, k_assign, k_noise = jax.random.split(key, 4)

    # Small shapes consistent with the module: (batch, embedding_dim, time).
    B, D, T = 2, 32, 16
    K = 128                        # num_embeddings
    commitment_cost = 0.25
    decay = 0.99
    epsilon = 1e-5
    N = B * T                      # flattened rows seen by the quantizer

    embedding_weight = jax.random.normal(k_emb, (K, D), dtype=jnp.float32)
    ema_cluster_size = jnp.zeros((K,), dtype=jnp.float32)      # module buffer init
    ema_w = jax.random.normal(k_emaw, (K, D), dtype=jnp.float32)

    # Inputs built as noisy codebook entries (well-separated argmin), laid back out
    # as (B, D, T) so the module's permute + view recovers them.
    assign = jax.random.randint(k_assign, (N,), 0, K)
    flat0 = embedding_weight[assign] + 0.05 * jax.random.normal(
        k_noise, (N, D), dtype=jnp.float32)
    inputs = jnp.transpose(flat0.reshape(D, T, B), (2, 0, 1))

    # ---- training mode ----
    outs = vector_quantizer_ema_forward(
        inputs, embedding_weight, ema_cluster_size, ema_w,
        commitment_cost=commitment_cost, decay=decay, epsilon=epsilon, training=True)
    outs = jax.block_until_ready(outs)
    (vq_loss, quantized, perplexity, encodings, distances, encoding_indices,
     new_emb, new_cs, new_ema_w) = outs

    ref = _reference_forward(inputs, embedding_weight, ema_cluster_size, ema_w,
                             commitment_cost, decay, epsilon, training=True)
    (r_loss, r_q, r_ppl, r_enc, r_dist, r_idx, r_emb, r_cs, r_emaw) = ref

    assert quantized.shape == inputs.shape and quantized.dtype == inputs.dtype
    assert bool(jnp.array_equal(encoding_indices[:, 0], r_idx)), "argmin mismatch"
    assert bool(jnp.array_equal(encodings, r_enc)), "one-hot encodings mismatch"
    assert bool(jnp.allclose(distances, r_dist, rtol=1e-2, atol=0.5)), "distances"
    assert bool(jnp.allclose(quantized, r_q, rtol=2e-2, atol=2e-2)), "quantized"
    assert bool(jnp.allclose(vq_loss, r_loss, rtol=2e-2, atol=1e-4)), "vq_loss"
    assert bool(jnp.allclose(perplexity, r_ppl, rtol=1e-3, atol=1e-3)), "perplexity"
    assert bool(jnp.allclose(new_emb, r_emb, rtol=1e-2, atol=1e-2)), "embedding"
    assert bool(jnp.allclose(new_cs, r_cs, rtol=1e-3, atol=1e-6)), "ema_cluster_size"
    assert bool(jnp.allclose(new_ema_w, r_emaw, rtol=1e-3, atol=1e-3)), "ema_w"

    # ---- eval mode (fused assign + quantize path) ----
    outs_e = vector_quantizer_ema_forward(
        inputs, embedding_weight, ema_cluster_size, ema_w,
        commitment_cost=commitment_cost, decay=decay, epsilon=epsilon, training=False)
    outs_e = jax.block_until_ready(outs_e)
    (e_loss, e_q, e_ppl, e_enc, e_dist, e_idx, e_emb, e_cs, e_emaw) = outs_e

    ref_e = _reference_forward(inputs, embedding_weight, ema_cluster_size, ema_w,
                               commitment_cost, decay, epsilon, training=False)
    (re_loss, re_q, re_ppl, re_enc, re_dist, re_idx, *_rest) = ref_e

    assert bool(jnp.array_equal(e_idx[:, 0], re_idx)), "eval argmin mismatch"
    assert bool(jnp.array_equal(e_enc, re_enc)), "eval encodings mismatch"
    assert bool(jnp.allclose(e_dist, re_dist, rtol=1e-2, atol=0.5)), "eval distances"
    assert bool(jnp.allclose(e_q, re_q, rtol=1e-5, atol=1e-5)), "eval quantized"
    assert bool(jnp.allclose(e_loss, re_loss, rtol=1e-3, atol=1e-6)), "eval vq_loss"
    assert bool(jnp.allclose(e_ppl, re_ppl, rtol=1e-4, atol=1e-4)), "eval perplexity"
    assert bool(jnp.array_equal(e_emb, embedding_weight)), "eval embedding changed"
    assert bool(jnp.array_equal(e_cs, ema_cluster_size)), "eval cluster_size changed"
    assert bool(jnp.array_equal(e_emaw, ema_w)), "eval ema_w changed"

    print("KERNEL_OK")
</pallas_src>

<mosaic_0001>
module attributes {stable_mosaic.version = 11 : i64} {
  func.func @_vq_ema_update_kernel(%arg0: memref<128x1xf32, #tpu.memory_space<vmem>>, %arg1: memref<128x32xf32, #tpu.memory_space<vmem>>, %arg2: memref<128x1xf32, #tpu.memory_space<vmem>>, %arg3: memref<128x32xf32, #tpu.memory_space<vmem>>, %arg4: memref<128x1xf32, #tpu.memory_space<vmem>>, %arg5: memref<128x32xf32, #tpu.memory_space<vmem>>, %arg6: memref<128x32xf32, #tpu.memory_space<vmem>>, %arg7: memref<1x1xf32, #tpu.memory_space<vmem>>) attributes {dimension_semantics = [], scalar_prefetch = 0 : i64, scratch_operands = 0 : i64, tpu.core_type = #tpu.core_type<tc>} {
    %c0 = arith.constant 0 : index
    %c0_0 = arith.constant 0 : index
    %0 = vector.load %arg0[%c0, %c0_0] : memref<128x1xf32, #tpu.memory_space<vmem>>, vector<128x1xf32>
    %c0_1 = arith.constant 0 : index
    %c0_2 = arith.constant 0 : index
    %1 = vector.load %arg2[%c0_1, %c0_2] : memref<128x1xf32, #tpu.memory_space<vmem>>, vector<128x1xf32>
    %cst = arith.constant 9.900000e-01 : f32
    %2 = vector.broadcast %cst : f32 to vector<128x1xf32>
    %3 = arith.mulf %1, %2 : vector<128x1xf32>
    %cst_3 = arith.constant 0.00999999977 : f32
    %4 = vector.broadcast %cst_3 : f32 to vector<128x1xf32>
    %5 = arith.mulf %4, %0 : vector<128x1xf32>
    %6 = arith.addf %3, %5 : vector<128x1xf32>
    %7 = vector.shape_cast %6 : vector<128x1xf32> to vector<1x128x1xf32>
    %cst_4 = arith.constant dense<0.000000e+00> : vector<1xf32>
    %8 = vector.multi_reduction <add>, %7, %cst_4 [1, 2] : vector<1x128x1xf32> to vector<1xf32>
    %9 = vector.shape_cast %8 : vector<1xf32> to vector<1x1x1xf32>
    %10 = vector.extract %9[0, 0, 0] : f32 from vector<1x1x1xf32>
    %11 = vector.broadcast %10 : f32 to vector<1x1xf32>
    %cst_5 = arith.constant 9.99999974E-6 : f32
    %12 = vector.broadcast %cst_5 : f32 to vector<128x1xf32>
    %13 = arith.addf %6, %12 : vector<128x1xf32>
    %cst_6 = arith.constant 1.280000e-03 : f32
    %14 = vector.broadcast %cst_6 : f32 to vector<1x1xf32>
    %15 = arith.addf %11, %14 : vector<1x1xf32>
    %16 = vector.broadcast %15 : vector<1x1xf32> to vector<128x1xf32>
    %17 = arith.divf %13, %16 : vector<128x1xf32>
    %18 = vector.broadcast %11 : vector<1x1xf32> to vector<128x1xf32>
    %19 = arith.mulf %17, %18 : vector<128x1xf32>
    %c0_7 = arith.constant 0 : index
    %c0_8 = arith.constant 0 : index
    %20 = vector.load %arg3[%c0_7, %c0_8] : memref<128x32xf32, #tpu.memory_space<vmem>>, vector<128x32xf32>
    %cst_9 = arith.constant 9.900000e-01 : f32
    %21 = vector.broadcast %cst_9 : f32 to vector<128x32xf32>
    %22 = arith.mulf %20, %21 : vector<128x32xf32>
    %c0_10 = arith.constant 0 : index
    %c0_11 = arith.constant 0 : index
    %23 = vector.load %arg1[%c0_10, %c0_11] : memref<128x32xf32, #tpu.memory_space<vmem>>, vector<128x32xf32>
    %cst_12 = arith.constant 0.00999999977 : f32
    %24 = vector.broadcast %cst_12 : f32 to vector<128x32xf32>
    %25 = arith.mulf %24, %23 : vector<128x32xf32>
    %26 = arith.addf %22, %25 : vector<128x32xf32>
    %c0_13 = arith.constant 0 : index
    %c0_14 = arith.constant 0 : index
    %27 = vector.load %arg4[%c0_13, %c0_14] : memref<128x1xf32, #tpu.memory_space<vmem>>, vector<128x1xf32>
    tpu.vector_store %arg4[%c0_13, %c0_14], %19 {strides = array<i32>} : memref<128x1xf32, #tpu.memory_space<vmem>>, vector<128x1xf32>,
    %c0_15 = arith.constant 0 : index
    %c0_16 = arith.constant 0 : index
    %28 = vector.load %arg5[%c0_15, %c0_16] : memref<128x32xf32, #tpu.memory_space<vmem>>, vector<128x32xf32>
    tpu.vector_store %arg5[%c0_15, %c0_16], %26 {strides = array<i32>} : memref<128x32xf32, #tpu.memory_space<vmem>>, vector<128x32xf32>,
    %29 = vector.broadcast %19 : vector<128x1xf32> to vector<128x32xf32>
    %30 = arith.divf %26, %29 : vector<128x32xf32>
    %c0_17 = arith.constant 0 : index
    %c0_18 = arith.constant 0 : index
    %31 = vector.load %arg6[%c0_17, %c0_18] : memref<128x32xf32, #tpu.memory_space<vmem>>, vector<128x32xf32>
    tpu.vector_store %arg6[%c0_17, %c0_18], %30 {strides = array<i32>} : memref<128x32xf32, #tpu.memory_space<vmem>>, vector<128x32xf32>,
    %cst_19 = arith.constant 3.125000e-02 : f32
    %32 = vector.broadcast %cst_19 : f32 to vector<128x1xf32>
    %33 = arith.mulf %0, %32 : vector<128x1xf32>
    %cst_20 = arith.constant 1.000000e-10 : f32
    %34 = vector.broadcast %cst_20 : f32 to vector<128x1xf32>
    %35 = arith.addf %33, %34 : vector<128x1xf32>
    %36 = math.log %35 : vector<128x1xf32>
    %37 = arith.mulf %33, %36 : vector<128x1xf32>
    %38 = vector.shape_cast %37 : vector<128x1xf32> to vector<1x128x1xf32>
    %cst_21 = arith.constant dense<0.000000e+00> : vector<1xf32>
    %39 = vector.multi_reduction <add>, %38, %cst_21 [1, 2] : vector<1x128x1xf32> to vector<1xf32>
    %40 = vector.shape_cast %39 : vector<1xf32> to vector<1x1x1xf32>
    %41 = vector.extract %40[0, 0, 0] : f32 from vector<1x1x1xf32>
    %42 = vector.broadcast %41 : f32 to vector<1x1xf32>
    %cst_22 = arith.constant 0.000000e+00 : f32
    %43 = vector.broadcast %cst_22 : f32 to vector<1x1xf32>
    %44 = arith.subf %43, %42 : vector<1x1xf32>
    %45 = math.exp %44 : vector<1x1xf32>
    %c0_23 = arith.constant 0 : index
    %c0_24 = arith.constant 0 : index
    %46 = vector.load %arg7[%c0_23, %c0_24] : memref<1x1xf32, #tpu.memory_space<vmem>>, vector<1x1xf32>
    tpu.vector_store %arg7[%c0_23, %c0_24], %45 {strides = array<i32>} : memref<1x1xf32, #tpu.memory_space<vmem>>, vector<1x1xf32>,
    return
  }
}

module attributes {stable_mosaic.version = 11 : i64} {
  func.func @_vq_assign_kernel(%arg0: i32, %arg1: i32, %arg2: memref<32x32xf32, #tpu.memory_space<vmem>>, %arg3: memref<32x128xf32, #tpu.memory_space<vmem>>, %arg4: memref<1x128xf32, #tpu.memory_space<vmem>>, %arg5: memref<32x128xf32, #tpu.memory_space<vmem>>, %arg6: memref<32x128xbf16, #tpu.memory_space<vmem>>, %arg7: memref<32x1xi32, #tpu.memory_space<vmem>>, %arg8: memref<8x128xf32, #tpu.memory_space<vmem>>, %arg9: memref<128x32xf32, #tpu.memory_space<vmem>>, %arg10: memref<1x128xf32, #tpu.memory_space<vmem>>, %arg11: memref<128x32xf32, #tpu.memory_space<vmem>>) attributes {dimension_semantics = [#tpu.dimension_semantics<parallel>, #tpu.dimension_semantics<arbitrary>], iteration_bounds = array<i64: 1, 1>, scalar_prefetch = 0 : i64, scratch_operands = 2 : i64, tpu.core_type = #tpu.core_type<tc>, window_params = [{transform_indices = @transform_0, window_bounds = array<i64: 32, 32>}, {pipeline_mode = #tpu.pipeline_mode<synchronous>, transform_indices = @transform_1, window_bounds = array<i64: 32, 128>}, {pipeline_mode = #tpu.pipeline_mode<synchronous>, transform_indices = @transform_2, window_bounds = array<i64: 1, 128>}, {transform_indices = @transform_3, window_bounds = array<i64: 32, 128>}, {transform_indices = @transform_4, window_bounds = array<i64: 32, 128>}, {transform_indices = @transform_5, window_bounds = array<i64: 32, 1>}, {transform_indices = @transform_6, window_bounds = array<i64: 8, 128>}, {transform_indices = @transform_7, window_bounds = array<i64: 128, 32>}]} {
    %c0_i32 = arith.constant 0 : i32
    %0 = arith.cmpi eq, %arg1, %c0_i32 : i32
    %1 = arith.extui %0 : i1 to i32
    %c0_i32_0 = arith.constant 0 : i32
    %2 = arith.cmpi ne, %1, %c0_i32_0 : i32
    scf.if %2 {
      %cst_32 = arith.constant 0.000000e+00 : f32
      %58 = vector.broadcast %cst_32 : f32 to vector<1x128xf32>
      %c0_33 = arith.constant 0 : index
      %c0_34 = arith.constant 0 : index
      %59 = vector.load %arg10[%c0_33, %c0_34] : memref<1x128xf32, #tpu.memory_space<vmem>>, vector<1x128xf32>
      tpu.vector_store %arg10[%c0_33, %c0_34], %58 {strides = array<i32>} : memref<1x128xf32, #tpu.memory_space<vmem>>, vector<1x128xf32>,
      %cst_35 = arith.constant 0.000000e+00 : f32
      %60 = vector.broadcast %cst_35 : f32 to vector<128x32xf32>
      %c0_36 = arith.constant 0 : index
      %c0_37 = arith.constant 0 : index
      %61 = vector.load %arg11[%c0_36, %c0_37] : memref<128x32xf32, #tpu.memory_space<vmem>>, vector<128x32xf32>
      tpu.vector_store %arg11[%c0_36, %c0_37], %60 {strides = array<i32>} : memref<128x32xf32, #tpu.memory_space<vmem>>, vector<128x32xf32>,
    } else {
    }
    %c0 = arith.constant 0 : index
    %c0_1 = arith.constant 0 : index
    %3 = vector.load %arg2[%c0, %c0_1] : memref<32x32xf32, #tpu.memory_space<vmem>>, vector<32x32xf32>
    %c0_2 = arith.constant 0 : index
    %c0_3 = arith.constant 0 : index
    %4 = vector.load %arg3[%c0_2, %c0_3] : memref<32x128xf32, #tpu.memory_space<vmem>>, vector<32x128xf32>
    %5 = arith.mulf %3, %3 : vector<32x32xf32>
    %cst = arith.constant dense<0.000000e+00> : vector<32xf32>
    %6 = vector.multi_reduction <add>, %5, %cst [1] : vector<32x32xf32> to vector<32xf32>
    %7 = vector.shape_cast %6 : vector<32xf32> to vector<32x1xf32>
    %cst_4 = arith.constant dense<0.000000e+00> : vector<32x128xf32>
    %8 = tpu.matmul %3, %4, %cst_4 {dimension_numbers = #tpu.dot_dimension_numbers<[1], [0], [0], [1], [0, 0, 1, 1], [], []>} : vector<32x32xf32>, vector<32x128xf32>, vector<32x128xf32> -> vector<32x128xf32>
    %cst_5 = arith.constant 2.000000e+00 : f32
    %9 = vector.broadcast %cst_5 : f32 to vector<32x128xf32>
    %10 = arith.mulf %9, %8 : vector<32x128xf32>
    %11 = vector.broadcast %7 : vector<32x1xf32> to vector<32x128xf32>
    %12 = arith.subf %11, %10 : vector<32x128xf32>
    %c0_6 = arith.constant 0 : index
    %c0_7 = arith.constant 0 : index
    %13 = vector.load %arg4[%c0_6, %c0_7] : memref<1x128xf32, #tpu.memory_space<vmem>>, vector<1x128xf32>
    %14 = vector.broadcast %13 : vector<1x128xf32> to vector<32x128xf32>
    %15 = arith.addf %12, %14 : vector<32x128xf32>
    %c0_8 = arith.constant 0 : index
    %c0_9 = arith.constant 0 : index
    %16 = vector.load %arg5[%c0_8, %c0_9] : memref<32x128xf32, #tpu.memory_space<vmem>>, vector<32x128xf32>
    tpu.vector_store %arg5[%c0_8, %c0_9], %15 {strides = array<i32>} : memref<32x128xf32, #tpu.memory_space<vmem>>, vector<32x128xf32>,
    %cst_10 = arith.constant dense<0x7F800000> : vector<32xf32>
    %17 = vector.multi_reduction <minimumf>, %15, %cst_10 [1] : vector<32x128xf32> to vector<32xf32>
    %18 = vector.shape_cast %17 : vector<32xf32> to vector<32x1xf32>
    %19 = tpu.iota {dimensions = array<i32: 1>} : vector<32x128xi32>
    %20 = vector.broadcast %18 : vector<32x1xf32> to vector<32x128xf32>
    %21 = arith.cmpf oeq, %15, %20 : vector<32x128xf32>
    %c128_i32 = arith.constant 128 : i32
    %22 = vector.broadcast %c128_i32 : i32 to vector<32x128xi32>
    %23 = arith.select %21, %19, %22 : vector<32x128xi1>, vector<32x128xi32>
    %cst_11 = arith.constant dense<2147483647> : vector<32xi32>
    %24 = vector.multi_reduction <minsi>, %23, %cst_11 [1] : vector<32x128xi32> to vector<32xi32>
    %25 = vector.shape_cast %24 : vector<32xi32> to vector<32x1xi32>
    %c1_i32 = arith.constant 1 : i32
    %26 = arith.muli %arg0, %c1_i32 : i32
    %27 = arith.addi %26, %arg1 : i32
    %c32_i32 = arith.constant 32 : i32
    %28 = arith.muli %27, %c32_i32 : i32
    %29 = tpu.iota {dimensions = array<i32: 0>} : vector<32x1xi32>
    %30 = vector.broadcast %28 : i32 to vector<32x1xi32>
    %31 = arith.addi %29, %30 : vector<32x1xi32>
    %c32_i32_12 = arith.constant 32 : i32
    %32 = vector.broadcast %c32_i32_12 : i32 to vector<32x1xi32>
    %33 = arith.cmpi slt, %31, %32 : vector<32x1xi32>
    %c128_i32_13 = arith.constant 128 : i32
    %34 = vector.broadcast %c128_i32_13 : i32 to vector<32x1xi32>
    %35 = arith.select %33, %25, %34 : vector<32x1xi1>, vector<32x1xi32>
    %c0_14 = arith.constant 0 : index
    %c0_15 = arith.constant 0 : index
    %36 = vector.load %arg7[%c0_14, %c0_15] : memref<32x1xi32, #tpu.memory_space<vmem>>, vector<32x1xi32>
    tpu.vector_store %arg7[%c0_14, %c0_15], %35 {strides = array<i32>} : memref<32x1xi32, #tpu.memory_space<vmem>>, vector<32x1xi32>,
    %37 = vector.broadcast %35 : vector<32x1xi32> to vector<32x128xi32>
    %38 = arith.cmpi eq, %19, %37 : vector<32x128xi32>
    %39 = arith.extui %38 : vector<32x128xi1> to vector<32x128xi32>
    %40 = arith.sitofp %39 : vector<32x128xi32> to vector<32x128xf32>
    %41 = arith.truncf %40 : vector<32x128xf32> to vector<32x128xbf16>
    %c0_16 = arith.constant 0 : index
    %c0_17 = arith.constant 0 : index
    %42 = vector.load %arg6[%c0_16, %c0_17] : memref<32x128xbf16, #tpu.memory_space<vmem>>, vector<32x128xbf16>
    tpu.vector_store %arg6[%c0_16, %c0_17], %41 {strides = array<i32>} : memref<32x128xbf16, #tpu.memory_space<vmem>>, vector<32x128xbf16>,
    %c0_18 = arith.constant 0 : index
    %c0_19 = arith.constant 0 : index
    %43 = vector.load %arg10[%c0_18, %c0_19] : memref<1x128xf32, #tpu.memory_space<vmem>>, vector<1x128xf32>
    %cst_20 = arith.constant dense<0.000000e+00> : vector<128xf32>
    %44 = vector.multi_reduction <add>, %40, %cst_20 [0] : vector<32x128xf32> to vector<128xf32>
    %45 = vector.shape_cast %44 : vector<128xf32> to vector<1x128xf32>
    %46 = arith.addf %43, %45 : vector<1x128xf32>
    %c0_21 = arith.constant 0 : index
    %c0_22 = arith.constant 0 : index
    %47 = vector.load %arg10[%c0_21, %c0_22] : memref<1x128xf32, #tpu.memory_space<vmem>>, vector<1x128xf32>
    tpu.vector_store %arg10[%c0_21, %c0_22], %46 {strides = array<i32>} : memref<1x128xf32, #tpu.memory_space<vmem>>, vector<1x128xf32>,
    %c0_i32_23 = arith.constant 0 : i32
    %48 = arith.cmpi eq, %arg1, %c0_i32_23 : i32
    %49 = arith.extui %48 : i1 to i32
    %c0_i32_24 = arith.constant 0 : i32
    %50 = arith.cmpi ne, %49, %c0_i32_24 : i32
    scf.if %50 {
      %c0_32 = arith.constant 0 : index
      %c0_33 = arith.constant 0 : index
      %58 = vector.load %arg10[%c0_32, %c0_33] : memref<1x128xf32, #tpu.memory_space<vmem>>, vector<1x128xf32>
      %cst_34 = arith.constant 1.000000e+00 : f32
      %59 = vector.broadcast %cst_34 : f32 to vector<8x1xf32>
      %60 = vector.broadcast %58 : vector<1x128xf32> to vector<8x128xf32>
      %61 = vector.broadcast %59 : vector<8x1xf32> to vector<8x128xf32>
      %62 = arith.mulf %60, %61 : vector<8x128xf32>
      %c0_35 = arith.constant 0 : index
      %c0_36 = arith.constant 0 : index
      %63 = vector.load %arg8[%c0_35, %c0_36] : memref<8x128xf32, #tpu.memory_space<vmem>>, vector<8x128xf32>
      tpu.vector_store %arg8[%c0_35, %c0_36], %62 {strides = array<i32>} : memref<8x128xf32, #tpu.memory_space<vmem>>, vector<8x128xf32>,
    } else {
    }
    %c0_25 = arith.constant 0 : index
    %c0_26 = arith.constant 0 : index
    %51 = vector.load %arg11[%c0_25, %c0_26] : memref<128x32xf32, #tpu.memory_space<vmem>>, vector<128x32xf32>
    %cst_27 = arith.constant dense<0.000000e+00> : vector<128x32xf32>
    %52 = tpu.matmul %40, %3, %cst_27 {dimension_numbers = #tpu.dot_dimension_numbers<[0], [0], [1], [1], [0, 1, 1, 1], [], []>} : vector<32x128xf32>, vector<32x32xf32>, vector<128x32xf32> -> vector<128x32xf32>
    %53 = arith.addf %51, %52 : vector<128x32xf32>
    %c0_28 = arith.constant 0 : index
    %c0_29 = arith.constant 0 : index
    %54 = vector.load %arg11[%c0_28, %c0_29] : memref<128x32xf32, #tpu.memory_space<vmem>>, vector<128x32xf32>
    tpu.vector_store %arg11[%c0_28, %c0_29], %53 {strides = array<i32>} : memref<128x32xf32, #tpu.memory_space<vmem>>, vector<128x32xf32>,
    %c0_i32_30 = arith.constant 0 : i32
    %55 = arith.cmpi eq, %arg1, %c0_i32_30 : i32
    %56 = arith.extui %55 : i1 to i32
    %c0_i32_31 = arith.constant 0 : i32
    %57 = arith.cmpi ne, %56, %c0_i32_31 : i32
    scf.if %57 {
      %c0_32 = arith.constant 0 : index
      %c0_33 = arith.constant 0 : index
      %58 = vector.load %arg11[%c0_32, %c0_33] : memref<128x32xf32, #tpu.memory_space<vmem>>, vector<128x32xf32>
      %c0_34 = arith.constant 0 : index
      %c0_35 = arith.constant 0 : index
      %59 = vector.load %arg9[%c0_34, %c0_35] : memref<128x32xf32, #tpu.memory_space<vmem>>, vector<128x32xf32>
      tpu.vector_store %arg9[%c0_34, %c0_35], %58 {strides = array<i32>} : memref<128x32xf32, #tpu.memory_space<vmem>>, vector<128x32xf32>,
    } else {
    }
    return
  }
  func.func @transform_0(%arg0: i32, %arg1: i32) -> (i32, i32) {
    %c1_i32 = arith.constant 1 : i32
    %0 = arith.muli %arg0, %c1_i32 : i32
    %1 = arith.addi %0, %arg1 : i32
    %c0_i32 = arith.constant 0 : i32
    %c0_i32_0 = arith.constant 0 : i32
    return %1, %c0_i32 : i32, i32
  }
  func.func @transform_1(%arg0: i32, %arg1: i32) -> (i32, i32) {
    %c0_i32 = arith.constant 0 : i32
    %c0_i32_0 = arith.constant 0 : i32
    %c0_i32_1 = arith.constant 0 : i32
    return %c0_i32, %c0_i32_0 : i32, i32
  }
  func.func @transform_2(%arg0: i32, %arg1: i32) -> (i32, i32) {
    %c0_i32 = arith.constant 0 : i32
    %c0_i32_0 = arith.constant 0 : i32
    %c0_i32_1 = arith.constant 0 : i32
    return %c0_i32, %c0_i32_0 : i32, i32
  }
  func.func @transform_3(%arg0: i32, %arg1: i32) -> (i32, i32) {
    %c1_i32 = arith.constant 1 : i32
    %0 = arith.muli %arg0, %c1_i32 : i32
    %1 = arith.addi %0, %arg1 : i32
    %c0_i32 = arith.constant 0 : i32
    %c0_i32_0 = arith.constant 0 : i32
    return %1, %c0_i32 : i32, i32
  }
  func.func @transform_4(%arg0: i32, %arg1: i32) -> (i32, i32) {
    %c1_i32 = arith.constant 1 : i32
    %0 = arith.muli %arg0, %c1_i32 : i32
    %1 = arith.addi %0, %arg1 : i32
    %c0_i32 = arith.constant 0 : i32
    %c0_i32_0 = arith.constant 0 : i32
    return %1, %c0_i32 : i32, i32
  }
  func.func @transform_5(%arg0: i32, %arg1: i32) -> (i32, i32) {
    %c1_i32 = arith.constant 1 : i32
    %0 = arith.muli %arg0, %c1_i32 : i32
    %1 = arith.addi %0, %arg1 : i32
    %c0_i32 = arith.constant 0 : i32
    %c0_i32_0 = arith.constant 0 : i32
    return %1, %c0_i32 : i32, i32
  }
  func.func @transform_6(%arg0: i32, %arg1: i32) -> (i32, i32) {
    %c0_i32 = arith.constant 0 : i32
    %c0_i32_0 = arith.constant 0 : i32
    return %arg0, %c0_i32 : i32, i32
  }
  func.func @transform_7(%arg0: i32, %arg1: i32) -> (i32, i32) {
    %c0_i32 = arith.constant 0 : i32
    %c0_i32_0 = arith.constant 0 : i32
    return %arg0, %c0_i32 : i32, i32
  }
}

module attributes {stable_mosaic.version = 11 : i64} {
  func.func @_vq_quantize_kernel(%arg0: i32, %arg1: memref<32x1xi32, #tpu.memory_space<vmem>>, %arg2: memref<32x32xf32, #tpu.memory_space<vmem>>, %arg3: memref<128x32xf32, #tpu.memory_space<vmem>>, %arg4: memref<32x32xf32, #tpu.memory_space<vmem>>, %arg5: memref<8x128xf32, #tpu.memory_space<vmem>>) attributes {dimension_semantics = [#tpu.dimension_semantics<parallel>], iteration_bounds = array<i64: 1>, scalar_prefetch = 0 : i64, scratch_operands = 0 : i64, tpu.core_type = #tpu.core_type<tc>, window_params = [{transform_indices = @transform_0, window_bounds = array<i64: 32, 1>}, {transform_indices = @transform_1, window_bounds = array<i64: 32, 32>}, {pipeline_mode = #tpu.pipeline_mode<synchronous>, transform_indices = @transform_2, window_bounds = array<i64: 128, 32>}, {transform_indices = @transform_3, window_bounds = array<i64: 32, 32>}, {transform_indices = @transform_4, window_bounds = array<i64: 8, 128>}]} {
    %c0 = arith.constant 0 : index
    %c0_0 = arith.constant 0 : index
    %0 = vector.load %arg3[%c0, %c0_0] : memref<128x32xf32, #tpu.memory_space<vmem>>, vector<128x32xf32>
    %c0_1 = arith.constant 0 : index
    %c0_2 = arith.constant 0 : index
    %1 = vector.load %arg1[%c0_1, %c0_2] : memref<32x1xi32, #tpu.memory_space<vmem>>, vector<32x1xi32>
    %2 = tpu.iota {dimensions = array<i32: 1>} : vector<32x128xi32>
    %3 = vector.broadcast %1 : vector<32x1xi32> to vector<32x128xi32>
    %4 = arith.cmpi eq, %2, %3 : vector<32x128xi32>
    %5 = arith.extui %4 : vector<32x128xi1> to vector<32x128xi32>
    %6 = arith.sitofp %5 : vector<32x128xi32> to vector<32x128xf32>
    %cst = arith.constant dense<0.000000e+00> : vector<32x32xf32>
    %7 = tpu.matmul %6, %0, %cst {dimension_numbers = #tpu.dot_dimension_numbers<[1], [0], [0], [1], [0, 0, 1, 1], [], []>} : vector<32x128xf32>, vector<128x32xf32>, vector<32x32xf32> -> vector<32x32xf32>
    %c0_3 = arith.constant 0 : index
    %c0_4 = arith.constant 0 : index
    %8 = vector.load %arg4[%c0_3, %c0_4] : memref<32x32xf32, #tpu.memory_space<vmem>>, vector<32x32xf32>
    tpu.vector_store %arg4[%c0_3, %c0_4], %7 {strides = array<i32>} : memref<32x32xf32, #tpu.memory_space<vmem>>, vector<32x32xf32>,
    %c0_5 = arith.constant 0 : index
    %c0_6 = arith.constant 0 : index
    %9 = vector.load %arg2[%c0_5, %c0_6] : memref<32x32xf32, #tpu.memory_space<vmem>>, vector<32x32xf32>
    %10 = tpu.iota {dimensions = array<i32: 0>} : vector<32x1xi32>
    %c32_i32 = arith.constant 32 : i32
    %11 = arith.muli %arg0, %c32_i32 : i32
    %12 = vector.broadcast %11 : i32 to vector<32x1xi32>
    %13 = arith.addi %10, %12 : vector<32x1xi32>
    %c32_i32_7 = arith.constant 32 : i32
    %14 = vector.broadcast %c32_i32_7 : i32 to vector<32x1xi32>
    %15 = arith.cmpi slt, %13, %14 : vector<32x1xi32>
    %16 = arith.subf %7, %9 : vector<32x32xf32>
    %cst_8 = arith.constant 0.000000e+00 : f32
    %17 = vector.shape_cast %15 : vector<32x1xi1> to vector<32x1xi1>
    %18 = vector.broadcast %17 : vector<32x1xi1> to vector<32x32xi1>
    %19 = vector.broadcast %cst_8 : f32 to vector<32x32xf32>
    %20 = arith.select %18, %16, %19 : vector<32x32xi1>, vector<32x32xf32>
    %21 = arith.mulf %20, %20 : vector<32x32xf32>
    %22 = vector.shape_cast %21 : vector<32x32xf32> to vector<1x32x32xf32>
    %cst_9 = arith.constant dense<0.000000e+00> : vector<1xf32>
    %23 = vector.multi_reduction <add>, %22, %cst_9 [1, 2] : vector<1x32x32xf32> to vector<1xf32>
    %24 = vector.shape_cast %23 : vector<1xf32> to vector<1x1x1xf32>
    %25 = vector.extract %24[0, 0, 0] : f32 from vector<1x1x1xf32>
    %26 = vector.broadcast %25 : f32 to vector<1x1xf32>
    %cst_10 = arith.constant 1.000000e+00 : f32
    %27 = vector.broadcast %cst_10 : f32 to vector<8x128xf32>
    %28 = vector.broadcast %26 : vector<1x1xf32> to vector<8x128xf32>
    %29 = arith.mulf %28, %27 : vector<8x128xf32>
    %c0_11 = arith.constant 0 : index
    %c0_12 = arith.constant 0 : index
    %30 = vector.load %arg5[%c0_11, %c0_12] : memref<8x128xf32, #tpu.memory_space<vmem>>, vector<8x128xf32>
    tpu.vector_store %arg5[%c0_11, %c0_12], %29 {strides = array<i32>} : memref<8x128xf32, #tpu.memory_space<vmem>>, vector<8x128xf32>,
    return
  }
  func.func @transform_0(%arg0: i32) -> (i32, i32) {
    %c0_i32 = arith.constant 0 : i32
    %c0_i32_0 = arith.constant 0 : i32
    return %arg0, %c0_i32 : i32, i32
  }
  func.func @transform_1(%arg0: i32) -> (i32, i32) {
    %c0_i32 = arith.constant 0 : i32
    %c0_i32_0 = arith.constant 0 : i32
    return %arg0, %c0_i32 : i32, i32
  }
  func.func @transform_2(%arg0: i32) -> (i32, i32) {
    %c0_i32 = arith.constant 0 : i32
    %c0_i32_0 = arith.constant 0 : i32
    %c0_i32_1 = arith.constant 0 : i32
    return %c0_i32, %c0_i32_0 : i32, i32
  }
  func.func @transform_3(%arg0: i32) -> (i32, i32) {
    %c0_i32 = arith.constant 0 : i32
    %c0_i32_0 = arith.constant 0 : i32
    return %arg0, %c0_i32 : i32, i32
  }
  func.func @transform_4(%arg0: i32) -> (i32, i32) {
    %c0_i32 = arith.constant 0 : i32
    %c0_i32_0 = arith.constant 0 : i32
    return %arg0, %c0_i32 : i32, i32
  }
}

</mosaic_0001>

<bundles_post_ra>
// kernel: vector_quantizer_ema_forward.5
= control target key start
LH: loop header
LB: loop body
LE: loop exit
PB: predicated region body
PF: predicated region fallthrough
CT: control target
= control target key end

     0   :  { %10 = vsyncpa [#allocation3], 0  ;;  %s650_s0 = inlined_call_operand.hbm [shape: s32[32,1], index: 0, kind: input, shape index: {}]   ;;  %s651_s1 = inlined_call_operand.hbm [shape: f32[32,32], index: 1, kind: input, shape index: {}]   ;;  %s652_s2 = inlined_call_operand.hbm [shape: f32[128,32], index: 2, kind: input, shape index: {}]   ;;  %s653_s3 = inlined_call_operand.hbm [shape: f32[32,32], index: 3, kind: output, shape index: {0}]   ;;  %s654_s4 = inlined_call_operand.hbm [shape: f32[8,128], index: 4, kind: output, shape index: {1}]  }
   0x1   :  { %11 = vsyncpa [#allocation6], 0 }
   0x2   :  { %12 = vsyncpa [#allocation4], 0 }
   0x3   :  { %13 = vsyncpa [#allocation10], 0  ;;  %s529_s15 = smov [#allocation5]   ;;  %s530_s17 = smov [#allocation2]  }
   0x4   :  { %s31_s16 = sshll.u32 %s529_s15, 4  ;;  %s19_s18 = sshll.u32 %s530_s17, 4  ;;  %s32_s16 = int_to_ptr.vmem [resolvable:$true] %s31_s16  ;;  %s563_s18 = int_to_ptr.vmem [resolvable:$true] %s19_s18 }
   0x5   :  { %s411_s21 = scalar_lea.hbm %s651_s1, 512 }
   0x6   :  { %p412_p0 = scmp.ne.s32.totalorder %s651_s1, %s411_s21  ;;  %p415_p1 = scmp.lt.u32.totalorder %s411_s21, %s651_s1 }
   0x8   :  { %p417_p2 = pnand %p415_p1, %p412_p0 }
   0xa   :  { %420 = shalt.err (!%p417_p2)
}
   0xb   :  { %s421_s26 = scalar_lea.vmem %s32_s16, 512  ;;  %p426_p4 = scmp.lt.s32.totalorder %s32_s16, %s32_s16 }
   0xc   :  { %p422_p3 = scmp.ne.s32.totalorder %s32_s16, %s421_s26  ;;  %p427_p5 = scmp.lt.s32.totalorder %s421_s26, %s421_s26 }
   0xe   :  { %p428_p6 = por %p427_p5, %p426_p4 }
  0x10   :  { %p429_p7 = pnand %p428_p6, %p422_p3 }
  0x12   :  { %432 = shalt.err (!%p429_p7)
}
  0x13   :  { %s531_s27 = smov 128   ;;  %s532_s28 = smov 8  }
  0x14   :  { %37 = dma.hbm_to_vmem [thread:$0]  %s651_s1, 512, %s32_s16, [#allocation6], %s531_s27, %s531_s27, %s532_s28  }
  0x15   :  { %s433_s7 = scalar_lea.hbm %s650_s0, 512 }
  0x16   :  { %p434_p8 = scmp.ne.s32.totalorder %s650_s0, %s433_s7  ;;  %p437_p9 = scmp.lt.u32.totalorder %s433_s7, %s650_s0 }
  0x18   :  { %p439_p10 = pnand %p437_p9, %p434_p8 }
  0x1a   :  { %442 = shalt.err (!%p439_p10)
}
  0x1b   :  { %s443_s12 = scalar_lea.vmem %s563_s18, 512  ;;  %p448_p12 = scmp.lt.s32.totalorder %s563_s18, %s563_s18 }
  0x1c   :  { %p444_p11 = scmp.ne.s32.totalorder %s563_s18, %s443_s12  ;;  %p449_p13 = scmp.lt.s32.totalorder %s443_s12, %s443_s12 }
  0x1e   :  { %p450_p0 = por %p449_p13, %p448_p12 }
  0x20   :  { %p451_p1 = pnand %p450_p0, %p444_p11 }
  0x22   :  { %454 = shalt.err (!%p451_p1)
}
  0x23   :  { %25 = dma.hbm_to_vmem [thread:$0]  %s650_s0, 512, %s563_s18, [#allocation3], %s531_s27, %s531_s27, %s532_s28  }
  0x24   :  { %s533_s14 = smov [#allocation7]   ;;  %s455_s19 = scalar_lea.hbm %s652_s2, 2048 }
  0x25   :  { %s43_s15 = sshll.u32 %s533_s14, 4  ;;  %p456_p2 = scmp.ne.s32.totalorder %s652_s2, %s455_s19  ;;  %s44_s15 = int_to_ptr.vmem [resolvable:$true] %s43_s15 }
  0x26   :  { %p459_p3 = scmp.lt.u32.totalorder %s455_s19, %s652_s2 }
  0x28   :  { %p461_p4 = pnand %p459_p3, %p456_p2 }
  0x2a   :  { %464 = shalt.err (!%p461_p4)
}
  0x2b   :  { %s465_s24 = scalar_lea.vmem %s44_s15, 2048  ;;  %p470_p6 = scmp.lt.s32.totalorder %s44_s15, %s44_s15 }
  0x2c   :  { %p466_p5 = scmp.ne.s32.totalorder %s44_s15, %s465_s24  ;;  %p471_p7 = scmp.lt.s32.totalorder %s465_s24, %s465_s24 }
  0x2e   :  { %p472_p8 = por %p471_p7, %p470_p6 }
  0x30   :  { %p473_p9 = pnand %p472_p8, %p466_p5 }
  0x32   :  { %476 = shalt.err (!%p473_p9)
}
  0x33   :  { %49 = dma.hbm_to_vmem [thread:$0]  %s652_s2, 2048, %s44_s15, [#allocation6], %s531_s27, %s531_s27, %s532_s28  }
  0x34   :  { %521 = dma.done.wait [#allocation3], 512  }
  0x35   :  { %522 = vsyncadd [#allocation3], 4294966784 }
  0x36   :  { %523 = dma.done.wait [#allocation6], 2560  }
  0x37   :  { %524 = vsyncadd [#allocation6], 4294964736  ;;  %v534_v0 = vmov 0   ;;  %v77_v1 = vld [vmem:[#allocation2 + $0x10] sm:$0xff]  ;;  %v75_v2 = vld [vmem:[#allocation2] sm:$0xff]  ;;  %v79_v29 = vlaneseq  ;;  %v535_v33 = vmov 1.0  }
  0x38   :  { %410 = vset.pattern.permute.xlu1 %v534_v0  ;;  %409 = vset.pattern.permute.xlu0 %v534_v0  ;;  %v78_v3 = vld [vmem:[#allocation2 + $0x18] sm:$0xff]  ;;  %v59_v4 = vld [vmem:[#allocation7] sm:$0xff]  ;;  %v60_v5 = vld [vmem:[#allocation7 + $0x8] sm:$0xff]  ;;  %vm190_vm4 = vcmask 261120   ;;  %s536_s2 = smov [#allocation8]  }
  0x39   :  { %88 = vperm.xlu1 %410, %v77_v1   ;;  %82 = vperm.xlu0 %409, %v75_v2   ;;  %v76_v6 = vld [vmem:[#allocation2 + $0x8] sm:$0xff]  ;;  %v350_v7 = vpack.c.bf16 %v60_v5, %v59_v4  ;;  %v61_v8 = vld [vmem:[#allocation7 + $0x10] sm:$0xff]  ;;  %v62_v9 = vld [vmem:[#allocation7 + $0x18] sm:$0xff]  ;;  %v80_v30 = vand.u32 127, %v79_v29  ;;  %s257_s25 = sshll.u32 %s536_s2, 4  ;;  %s258_s25 = int_to_ptr.vmem [resolvable:$true] %s257_s25 }
  0x3a   :  { %v354_v10 = vpack.c.bf16 %v62_v9, %v61_v8  ;;  %v63_v11 = vld [vmem:[#allocation7 + $0x20] sm:$0xff]  ;;  %v64_v12 = vld [vmem:[#allocation7 + $0x28] sm:$0xff]  ;;  %v65_v14 = vld [vmem:[#allocation7 + $0x30] sm:$0xff]  ;;  %s477_s26 = scalar_lea.vmem %s258_s25, 512  ;;  %p482_p11 = scmp.lt.s32.totalorder %s258_s25, %s258_s25 }
  0x3b   :  { %351 = vmatprep.subr.bf16.mxu0 %v350_v7  ;;  %382 = vmatprep.subr.bf16.mxu1 %v350_v7  ;;  %v358_v13 = vpack.c.bf16 %v64_v12, %v63_v11  ;;  %v66_v15 = vld [vmem:[#allocation7 + $0x38] sm:$0xff]  ;;  %v67_v17 = vld [vmem:[#allocation7 + $0x40] sm:$0xff]  ;;  %v68_v18 = vld [vmem:[#allocation7 + $0x48] sm:$0xff]  ;;  %p478_p10 = scmp.ne.s32.totalorder %s258_s25, %s477_s26  ;;  %p483_p12 = scmp.lt.s32.totalorder %s477_s26, %s477_s26 }
  0x3c   :  { %353 = vmatpush3.bf16.msra.mxu0 %v350_v7  ;;  %390 = vmatpush3.bf16.msra.mxu1 %v350_v7  ;;  %v362_v16 = vpack.c.bf16 %v66_v15, %v65_v14  ;;  %v366_v19 = vpack.c.bf16 %v68_v18, %v67_v17  ;;  %v69_v20 = vld [vmem:[#allocation7 + $0x50] sm:$0xff]  ;;  %v70_v21 = vld [vmem:[#allocation7 + $0x58] sm:$0xff]  ;;  %v71_v23 = vld [vmem:[#allocation7 + $0x60] sm:$0xff] }
  0x3d   :  { %91 = vperm.xlu1 %410, %v78_v3   ;;  %85 = vperm.xlu0 %409, %v76_v6   ;;  %v370_v22 = vpack.c.bf16 %v70_v21, %v69_v20  ;;  %v72_v24 = vld [vmem:[#allocation7 + $0x68] sm:$0xff]  ;;  %v73_v26 = vld [vmem:[#allocation7 + $0x70] sm:$0xff]  ;;  %v74_v27 = vld [vmem:[#allocation7 + $0x78] sm:$0xff]  ;;  %p484_p13 = por %p483_p12, %p482_p11 }
  0x3e   :  { %355 = vmatprep.subr.bf16.mxu0 %v354_v10  ;;  %383 = vmatprep.subr.bf16.mxu1 %v354_v10  ;;  %v374_v25 = vpack.c.bf16 %v72_v24, %v71_v23  ;;  %v378_v28 = vpack.c.bf16 %v74_v27, %v73_v26  ;;  %v196_v36 = vld [vmem:[#allocation5 + $0x8] sm:$0xff]  ;;  %v198_v37 = vld [vmem:[#allocation5 + $0x18] sm:$0xff]  ;;  %v195_v38 = vld [vmem:[#allocation5] sm:$0xff] }
  0x3f   :  { %v197_v39 = vld [vmem:[#allocation5 + $0x10] sm:$0xff]  ;;  %p485_p0 = pnand %p484_p13, %p478_p10 }
  0x40   :  { %357 = vmatpush3.bf16.msra.mxu0 %v354_v10  ;;  %391 = vmatpush3.bf16.msra.mxu1 %v354_v10 }
  0x41   :  { %359 = vmatprep.subr.bf16.mxu0 %v358_v13  ;;  %384 = vmatprep.subr.bf16.mxu1 %v358_v13 }
  0x44   :  { %361 = vmatpush3.bf16.msra.mxu0 %v358_v13  ;;  %392 = vmatpush3.bf16.msra.mxu1 %v358_v13 }
  0x45   :  { %363 = vmatprep.subr.bf16.mxu0 %v362_v16  ;;  %385 = vmatprep.subr.bf16.mxu1 %v362_v16 }
  0x48   :  { %365 = vmatpush3.bf16.msra.mxu0 %v362_v16  ;;  %393 = vmatpush3.bf16.msra.mxu1 %v362_v16 }
  0x49   :  { %367 = vmatprep.subr.bf16.mxu0 %v366_v19  ;;  %386 = vmatprep.subr.bf16.mxu1 %v366_v19 }
  0x4c   :  { %369 = vmatpush3.bf16.msra.mxu0 %v366_v19  ;;  %394 = vmatpush3.bf16.msra.mxu1 %v366_v19 }
  0x4d   :  { %371 = vmatprep.subr.bf16.mxu0 %v370_v22  ;;  %387 = vmatprep.subr.bf16.mxu1 %v370_v22 }
  0x50   :  { %373 = vmatpush3.bf16.msra.mxu0 %v370_v22  ;;  %395 = vmatpush3.bf16.msra.mxu1 %v370_v22 }
  0x51   :  { %375 = vmatprep.subr.bf16.mxu0 %v374_v25  ;;  %388 = vmatprep.subr.bf16.mxu1 %v374_v25 }
  0x54   :  { %377 = vmatpush3.bf16.msra.mxu0 %v374_v25  ;;  %396 = vmatpush3.bf16.msra.mxu1 %v374_v25 }
  0x55   :  { %379 = vmatprep.subr.bf16.mxu0 %v378_v28  ;;  %389 = vmatprep.subr.bf16.mxu1 %v378_v28 }
  0x58   :  { %381 = vmatpush3.bf16.msra.mxu0 %v378_v28  ;;  %397 = vmatpush3.bf16.msra.mxu1 %v378_v28 }
  0xb8   :  { %v89_v31 = vpop.permute.xlu1 %88  ;;  %v83_v32 = vpop.permute.xlu0 %82 }
  0xb9   :  { %vm93_vm0 = vcmp.eq.s32.totalorder %v80_v30, %v83_v32  ;;  %vm95_vm1 = vcmp.eq.s32.totalorder %v80_v30, %v89_v31 }
  0xba   :  { %344 = vmatprep.mubr.msk.f32.mxu0 %vm93_vm0, %v535_v33  ;;  %347 = vmatprep.mubr.msk.f32.mxu1 %vm95_vm1, %v535_v33 }
  0xbc   :  { %v92_v34 = vpop.permute.xlu1 %91  ;;  %v86_v35 = vpop.permute.xlu0 %85 }
  0xbd   :  { %vm96_vm2 = vcmp.eq.s32.totalorder %v80_v30, %v92_v34  ;;  %vm94_vm3 = vcmp.eq.s32.totalorder %v80_v30, %v86_v35 }
  0xbe   :  { %345 = vmatmul.mubr.msk.f32.vlgmr.msra.gmra.mrb[0].mxu0 %vm94_vm3, %v535_v33  ;;  %348 = vmatmul.mubr.msk.f32.vlgmr.msra.gmra.mrb[0].mxu1 %vm96_vm2, %v535_v33 }
 0x191   :  { %v346_v40 = vpop.f32.mrb[0].mxu0  ;;  %v349_v41 = vpop.f32.mrb[0].mxu1 }
 0x192   :  { %192 = vst.msk [vmem:[#allocation8 + $0x8] sm:$0xff] %vm190_vm4, %v346_v40  ;;  %v215_v42 = vsub.f32 %v346_v40, %v196_v36  ;;  %194 = vst.msk [vmem:[#allocation8 + $0x18] sm:$0xff] %vm190_vm4, %v349_v41  ;;  %v171_v43 = vpop.f32.mrb[1].mxu0  ;;  %v181_v44 = vpop.f32.mrb[1].mxu1  ;;  %v217_v45 = vsub.f32 %v349_v41, %v198_v37 }
 0x193   :  { %191 = vst.msk [vmem:[#allocation8] sm:$0xff] %vm190_vm4, %v171_v43  ;;  %v214_v46 = vsub.f32 %v171_v43, %v195_v38  ;;  %193 = vst.msk [vmem:[#allocation8 + $0x10] sm:$0xff] %vm190_vm4, %v181_v44  ;;  %v216_v47 = vsub.f32 %v181_v44, %v197_v39 }
 0x194   :  { %v231_v48 = vmul.f32 %v215_v42, %v215_v42  ;;  %v233_v52 = vmul.f32 %v217_v45, %v217_v45 }
 0x195   :  { %v230_v49 = vmul.f32 %v214_v46, %v214_v46  ;;  %v232_v50 = vmul.f32 %v216_v47, %v216_v47 }
 0x196   :  { %v235_v51 = vsel %vm190_vm4, %v231_v48, 0.0  ;;  %v239_v57 = vsel %vm190_vm4, %v233_v52, 0.0 }
 0x197   :  { %v234_v53 = vsel %vm190_vm4, %v230_v49, 0.0  ;;  %v237_v55 = vsel %vm190_vm4, %v232_v50, 0.0 }
 0x198   :  { %v236_v54 = vadd.f32 %v235_v51, %v234_v53 }
 0x19a   :  { %v238_v56 = vadd.f32 %v237_v55, %v236_v54 }
 0x19c   :  { %v240_v58 = vadd.f32 %v239_v57, %v238_v56 }
 0x19e   :  { %241 = vadd.xlane.f32.xlu0 %v240_v58 }
 0x19f   :  { %488 = shalt.err (!%p485_p0)
}
 0x1a0   :  { %s489_s5 = scalar_lea.hbm %s653_s3, 512 }
 0x1a1   :  { %p490_p1 = scmp.ne.s32.totalorder %s653_s3, %s489_s5  ;;  %p493_p2 = scmp.lt.u32.totalorder %s489_s5, %s653_s3 }
 0x1a3   :  { %p495_p3 = pnand %p493_p2, %p490_p1 }
 0x1a5   :  { %498 = shalt.err (!%p495_p3)
}
 0x1a6   :  { %263 = dma.vmem_to_hbm [thread:$0]  %s258_s25, 512, %s653_s3, [#allocation4], %s531_s27, %s531_s27, %s532_s28  }
 0x1a7   :  { %s537_s12 = smov [#allocation9]  }
 0x1a8   :  { %s270_s1 = sshll.u32 %s537_s12, 4  ;;  %s271_s1 = int_to_ptr.vmem [resolvable:$true] %s270_s1 }
 0x1a9   :  { %s499_s14 = scalar_lea.vmem %s271_s1, 128  ;;  %p504_p5 = scmp.lt.s32.totalorder %s271_s1, %s271_s1 }
 0x1aa   :  { %p500_p4 = scmp.ne.s32.totalorder %s271_s1, %s499_s14  ;;  %p505_p6 = scmp.lt.s32.totalorder %s499_s14, %s499_s14 }
 0x1ac   :  { %p506_p7 = por %p505_p6, %p504_p5 }
 0x1ae   :  { %p507_p8 = pnand %p506_p7, %p500_p4 }
 0x22b   :  { %v242_v59 = vpop.xlane.xlu0 %241 }
 0x22c   :  { %v243_v60 = vrot.slane %v242_v59, 4 }
 0x22e   :  { %v244_v61 = vadd.f32 %v243_v60, %v242_v59 }
 0x230   :  { %v245_v62 = vrot.slane %v244_v61, 2 }
 0x232   :  { %v246_v63 = vadd.f32 %v245_v62, %v244_v61 }
 0x234   :  { %v247_v0 = vrot.slane %v246_v63, 1 }
 0x236   :  { %v248_v1 = vadd.f32 %v247_v0, %v246_v63 }
 0x238   :  { %398 = vpush %v248_v1 }
 0x269   :  { %s399_s13 = spop %398 }
 0x26a   :  { %v250_v2 = vstv %s399_s13 }
 0x26b   :  { %251 = vst [vmem:[#allocation9] sm:$0xff] %v250_v2 }
 0x26c   :  { %510 = shalt.err (!%p507_p8)
}
 0x26d   :  { %s511_s28 = scalar_lea.hbm %s654_s4, 128 }
 0x26e   :  { %p512_p9 = scmp.ne.s32.totalorder %s654_s4, %s511_s28  ;;  %p515_p10 = scmp.lt.u32.totalorder %s511_s28, %s654_s4 }
 0x270   :  { %p517_p11 = pnand %p515_p10, %p512_p9 }
 0x272   :  { %520 = shalt.err (!%p517_p11)
}
 0x273   :  { %273 = dma.vmem_to_hbm [thread:$0]  %s271_s1, 128, %s654_s4, [#allocation10]  }
 0x274   :  { %525 = dma.done.wait [#allocation4], 512  }
 0x275   :  { %526 = vsyncadd [#allocation4], 4294966784 }
 0x276   :  { %527 = dma.done.wait [#allocation10], 128  }
 0x277   :  { %528 = vsyncadd [#allocation10], 4294967168 }
 0x278   :  { %280 = vsyncpa [#allocation3], 1 }
 0x279   :  { %281 = vsyncpa [#allocation6], 1 }
 0x27a   :  { %282 = vsyncpa [#allocation4], 1 }
 0x27b   :  { %283 = vsyncpa [#allocation10], 1 }

// kernel: vector_quantizer_ema_forward.4
= control target key start
LH: loop header
LB: loop body
LE: loop exit
PB: predicated region body
PF: predicated region fallthrough
CT: control target
= control target key end

     0   :  { %13 = vsyncpa [#allocation3], 0  ;;  %s1457_s0 = inlined_call_operand.vmem [shape: f32[128,1], index: 0, kind: input, shape index: {}]   ;;  %s1458_s1 = inlined_call_operand.vmem [shape: f32[128,32], index: 1, kind: input, shape index: {}]   ;;  %s1459_s2 = inlined_call_operand.vmem [shape: f32[128,1], index: 2, kind: input, shape index: {}]   ;;  %s1460_s3 = inlined_call_operand.vmem [shape: f32[128,32], index: 3, kind: input, shape index: {}]   ;;  %s1461_s4 = inlined_call_operand.hbm [shape: f32[128,1], index: 4, kind: output, shape index: {0}]   ;;  %s1462_s5 = inlined_call_operand.hbm [shape: f32[128,32], index: 5, kind: output, shape index: {1}]   ;;  %s1463_s6 = inlined_call_operand.hbm [shape: f32[128,32], index: 6, kind: output, shape index: {2}]   ;;  %s1464_s7 = inlined_call_operand.hbm [shape: f32[1,1], index: 7, kind: output, shape index: {3}]  }
   0x1   :  { %14 = vsyncpa [#allocation5], 0  ;;  %v849_v0 = vld [vmem:[%s1457_s0] sm:$0xff]  ;;  %v854_v1 = vld [vmem:[%s1457_s0 + $0x8] sm:$0xff]  ;;  %vm104_vm0 = vcmask 7168  }
   0x2   :  { %v859_v2 = vld [vmem:[%s1457_s0 + $0x10] sm:$0xff]  ;;  %v40_v3 = vld [vmem:[%s1459_s2] sm:$0xff]  ;;  %v41_v4 = vld [vmem:[%s1459_s2 + $0x8] sm:$0xff]  ;;  %v72_v8 = vmul.f32 0.01, %v849_v0 }
   0x3   :  { %v42_v5 = vld [vmem:[%s1459_s2 + $0x10] sm:$0xff]  ;;  %v873_v6 = vld [vmem:[%s1457_s0 + $0x18] sm:$0xff]  ;;  %v878_v7 = vld [vmem:[%s1457_s0 + $0x20] sm:$0xff]  ;;  %v73_v11 = vmul.f32 0.01, %v854_v1 }
   0x4   :  { %v43_v9 = vld [vmem:[%s1459_s2 + $0x18] sm:$0xff]  ;;  %v44_v10 = vld [vmem:[%s1459_s2 + $0x20] sm:$0xff]  ;;  %v74_v12 = vmul.f32 0.01, %v859_v2  ;;  %v56_v13 = vmul.f32 0.99, %v40_v3 }
   0x5   :  { %v57_v14 = vmul.f32 0.99, %v41_v4  ;;  %v58_v15 = vmul.f32 0.99, %v42_v5  ;;  %v59_v16 = vmul.f32 0.99, %v43_v9 }
   0x6   :  { %v75_v17 = vmul.f32 0.01, %v873_v6  ;;  %v893_v18 = vld [vmem:[%s1457_s0 + $0x28] sm:$0xff]  ;;  %v60_v20 = vmul.f32 0.99, %v44_v10  ;;  %v46_v22 = vld [vmem:[%s1459_s2 + $0x30] sm:$0xff]  ;;  %v902_v23 = vadd.f32 %v72_v8, %v56_v13 }
   0x7   :  { %v45_v19 = vld [vmem:[%s1459_s2 + $0x28] sm:$0xff]  ;;  %v76_v21 = vmul.f32 0.01, %v878_v7  ;;  %v904_v24 = vadd.f32 %v73_v11, %v57_v14  ;;  %v906_v25 = vadd.f32 %v74_v12, %v58_v15  ;;  %v911_v26 = vld [vmem:[%s1457_s0 + $0x30] sm:$0xff]  ;;  %v77_v28 = vmul.f32 0.01, %v893_v18 }
   0x8   :  { %v61_v27 = vmul.f32 0.99, %v45_v19  ;;  %v914_v29 = vadd.f32 %v75_v17, %v59_v16 }
   0x9   :  { %15 = vsyncpa [#allocation8], 0  ;;  %v919_v30 = vld [vmem:[%s1457_s0 + $0x38] sm:$0xff]  ;;  %v62_v32 = vmul.f32 0.99, %v46_v22  ;;  %v924_v33 = vadd.f32 %v76_v21, %v60_v20  ;;  %v105_v35 = vsel %vm104_vm0, %v902_v23, 0.0 }
   0xa   :  { %v47_v31 = vld [vmem:[%s1459_s2 + $0x38] sm:$0xff]  ;;  %v78_v34 = vmul.f32 0.01, %v911_v26  ;;  %v106_v36 = vsel %vm104_vm0, %v904_v24, 0.0  ;;  %v108_v37 = vsel %vm104_vm0, %v906_v25, 0.0  ;;  %v936_v38 = vld [vmem:[%s1457_s0 + $0x40] sm:$0xff]  ;;  %v942_v43 = vadd.f32 %v77_v28, %v61_v27 }
   0xb   :  { %v48_v39 = vld [vmem:[%s1459_s2 + $0x40] sm:$0xff]  ;;  %v107_v40 = vadd.f32 %v106_v36, %v105_v35  ;;  %v63_v41 = vmul.f32 0.99, %v47_v31  ;;  %v79_v42 = vmul.f32 0.01, %v919_v30  ;;  %v110_v44 = vsel %vm104_vm0, %v914_v29, 0.0 }
   0xc   :  { %v949_v45 = vld [vmem:[%s1457_s0 + $0x48] sm:$0xff]  ;;  %v64_v48 = vmul.f32 0.99, %v48_v39  ;;  %v80_v49 = vmul.f32 0.01, %v936_v38  ;;  %v955_v50 = vadd.f32 %v78_v34, %v62_v32  ;;  %v112_v51 = vsel %vm104_vm0, %v924_v33, 0.0 }
   0xd   :  { %v49_v46 = vld [vmem:[%s1459_s2 + $0x48] sm:$0xff]  ;;  %v109_v47 = vadd.f32 %v108_v37, %v107_v40  ;;  %v962_v52 = vld [vmem:[%s1457_s0 + $0x50] sm:$0xff]  ;;  %v81_v56 = vmul.f32 0.01, %v949_v45  ;;  %v968_v57 = vadd.f32 %v79_v42, %v63_v41  ;;  %v114_v58 = vsel %vm104_vm0, %v942_v43, 0.0  ;;  %v975_v59 = vld [vmem:[%s1457_s0 + $0x58] sm:$0xff] }
   0xe   :  { %v50_v53 = vld [vmem:[%s1459_s2 + $0x50] sm:$0xff]  ;;  %v65_v55 = vmul.f32 0.99, %v49_v46  ;;  %v51_v60 = vld [vmem:[%s1459_s2 + $0x58] sm:$0xff]  ;;  %v82_v63 = vmul.f32 0.01, %v962_v52  ;;  %v981_v3 = vadd.f32 %v80_v49, %v64_v48 }
   0xf   :  { %v111_v54 = vadd.f32 %v110_v44, %v109_v47  ;;  %v66_v62 = vmul.f32 0.99, %v50_v53  ;;  %v116_v4 = vsel %vm104_vm0, %v955_v50, 0.0  ;;  %v988_v5 = vld [vmem:[%s1457_s0 + $0x60] sm:$0xff]  ;;  %v67_v10 = vmul.f32 0.99, %v51_v60 }
  0x10   :  { %v52_v8 = vld [vmem:[%s1459_s2 + $0x60] sm:$0xff]  ;;  %v83_v11 = vmul.f32 0.01, %v975_v59  ;;  %v994_v12 = vadd.f32 %v81_v56, %v65_v55  ;;  %v118_v13 = vsel %vm104_vm0, %v968_v57, 0.0  ;;  %v1001_v14 = vld [vmem:[%s1457_s0 + $0x68] sm:$0xff]  ;;  %v120_v21 = vsel %vm104_vm0, %v981_v3, 0.0 }
  0x11   :  { %v113_v61 = vadd.f32 %v112_v51, %v111_v54  ;;  %v53_v15 = vld [vmem:[%s1459_s2 + $0x68] sm:$0xff]  ;;  %v68_v17 = vmul.f32 0.99, %v52_v8  ;;  %v84_v19 = vmul.f32 0.01, %v988_v5  ;;  %v1007_v20 = vadd.f32 %v82_v63, %v66_v62  ;;  %v1014_v22 = vld [vmem:[%s1457_s0 + $0x70] sm:$0xff] }
  0x12   :  { %v54_v27 = vld [vmem:[%s1459_s2 + $0x70] sm:$0xff]  ;;  %v69_v31 = vmul.f32 0.99, %v53_v15  ;;  %v85_v32 = vmul.f32 0.01, %v1001_v14  ;;  %v1020_v34 = vadd.f32 %v83_v11, %v67_v10  ;;  %v122_v35 = vsel %vm104_vm0, %v994_v12, 0.0 }
  0x13   :  { %v115_v9 = vadd.f32 %v114_v58, %v113_v61  ;;  %v1027_v36 = vld [vmem:[%s1457_s0 + $0x78] sm:$0xff]  ;;  %v70_v40 = vmul.f32 0.99, %v54_v27  ;;  %v86_v41 = vmul.f32 0.01, %v1014_v22  ;;  %v1033_v42 = vadd.f32 %v84_v19, %v68_v17  ;;  %s800_s10 = smov [#allocation4]  }
  0x14   :  { %v55_v37 = vld [vmem:[%s1459_s2 + $0x78] sm:$0xff]  ;;  %v124_v44 = vsel %vm104_vm0, %v1007_v20, 0.0  ;;  %v87_v48 = vmul.f32 0.01, %v1027_v36  ;;  %v1038_v49 = vadd.f32 %v85_v32, %v69_v31  ;;  %v126_v51 = vsel %vm104_vm0, %v1020_v34, 0.0  ;;  %s580_s11 = sshll.u32 %s800_s10, 4  ;;  %s581_s11 = int_to_ptr.vmem [resolvable:$true] %s580_s11 }
  0x15   :  { %v117_v16 = vadd.f32 %v116_v4, %v115_v9  ;;  %v71_v47 = vmul.f32 0.99, %v55_v37  ;;  %v1042_v54 = vadd.f32 %v86_v41, %v70_v40  ;;  %v128_v55 = vsel %vm104_vm0, %v1033_v42, 0.0  ;;  %s801_s12 = smov [#allocation2]   ;;  %p710_p1 = scmp.lt.s32.totalorder %s581_s11, %s581_s11 }
  0x16   :  { %v130_v60 = vsel %vm104_vm0, %v1038_v49, 0.0  ;;  %v437_v10 = vmul.f32 0.03125, %v849_v0  ;;  %v438_v11 = vmul.f32 0.03125, %v854_v1  ;;  %v440_v17 = vmul.f32 0.03125, %v873_v6  ;;  %s568_s13 = sshll.u32 %s801_s12, 4  ;;  %s1361_s13 = int_to_ptr.vmem [resolvable:$true] %s568_s13 }
  0x17   :  { %v119_v28 = vadd.f32 %v118_v13, %v117_v16  ;;  %v1046_v58 = vadd.f32 %v87_v48, %v71_v47  ;;  %v132_v62 = vsel %vm104_vm0, %v1042_v54, 0.0  ;;  %v439_v13 = vmul.f32 0.03125, %v859_v2 }
  0x18   :  { %v453_v15 = vadd.f32 1e-10, %v437_v10  ;;  %v454_v16 = vadd.f32 1e-10, %v438_v11  ;;  %v456_v27 = vadd.f32 1e-10, %v440_v17 }
  0x19   :  { %v121_v39 = vadd.f32 %v120_v21, %v119_v28  ;;  %v134_v4 = vsel %vm104_vm0, %v1046_v58, 0.0  ;;  %v455_v19 = vadd.f32 1e-10, %v439_v13  ;;  %v441_v21 = vmul.f32 0.03125, %v878_v7 }
  0x1a   :  { %637 = vlog2.f32 %v453_v15  ;;  %v442_v28 = vmul.f32 0.03125, %v893_v18  ;;  %v443_v0 = vmul.f32 0.03125, %v911_v26  ;;  %v1062_v2 = vmul.f32 0.03125, %v919_v30 }
  0x1b   :  { %v123_v46 = vadd.f32 %v122_v35, %v121_v39  ;;  %639 = vlog2.f32 %v454_v16  ;;  %v457_v31 = vadd.f32 1e-10, %v441_v21  ;;  %v1065_v6 = vmul.f32 0.03125, %v936_v38 }
  0x1c   :  { %641 = vlog2.f32 %v455_v19  ;;  %v458_v1 = vadd.f32 1e-10, %v442_v28  ;;  %v459_v32 = vadd.f32 1e-10, %v443_v0  ;;  %v460_v7 = vadd.f32 1e-10, %v1062_v2 }
  0x1d   :  { %v125_v53 = vadd.f32 %v124_v44, %v123_v46  ;;  %643 = vlog2.f32 %v456_v27  ;;  %v1069_v18 = vmul.f32 0.03125, %v949_v45  ;;  %v1072_v37 = vmul.f32 0.03125, %v962_v52 }
  0x1e   :  { %645 = vlog2.f32 %v457_v31  ;;  %v1075_v26 = vmul.f32 0.03125, %v975_v59  ;;  %v1078_v30 = vmul.f32 0.03125, %v988_v5  ;;  %v1081_v38 = vmul.f32 0.03125, %v1001_v14 }
  0x1f   :  { %v127_v56 = vadd.f32 %v126_v51, %v125_v53  ;;  %647 = vlog2.f32 %v458_v1  ;;  %v461_v40 = vadd.f32 1e-10, %v1065_v6  ;;  %v462_v44 = vadd.f32 1e-10, %v1069_v18 }
  0x20   :  { %649 = vlog2.f32 %v459_v32  ;;  %v463_v45 = vadd.f32 1e-10, %v1072_v37  ;;  %v464_v52 = vadd.f32 1e-10, %v1075_v26  ;;  %v1088_v59 = vmul.f32 0.03125, %v1014_v22 }
  0x21   :  { %v129_v61 = vadd.f32 %v128_v55, %v127_v56  ;;  %651 = vlog2.f32 %v460_v7  ;;  %v1091_v5 = vmul.f32 0.03125, %v1027_v36  ;;  %v465_v14 = vadd.f32 1e-10, %v1078_v30 }
  0x22   :  { %653 = vlog2.f32 %v461_v40  ;;  %v466_v53 = vadd.f32 1e-10, %v1081_v38  ;;  %vm292_vm1 = vcmask 261120  }
  0x23   :  { %v131_v63 = vadd.f32 %v130_v60, %v129_v61  ;;  %655 = vlog2.f32 %v462_v44  ;;  %v468_v31 = vadd.f32 1e-10, %v1091_v5 }
  0x24   :  { %v638_v35 = vpop.eup %637  ;;  %657 = vlog2.f32 %v463_v45 }
  0x25   :  { %v133_v8 = vadd.f32 %v132_v62, %v131_v63  ;;  %v640_v39 = vpop.eup %639  ;;  %v470_v47 = vmul.f32 0.6931472, %v638_v35  ;;  %659 = vlog2.f32 %v464_v52 }
  0x26   :  { %v642_v41 = vpop.eup %641  ;;  %v472_v48 = vmul.f32 0.6931472, %v640_v39  ;;  %661 = vlog2.f32 %v465_v14 }
  0x27   :  { %v135_v9 = vadd.f32 %v134_v4, %v133_v8  ;;  %v644_v46 = vpop.eup %643  ;;  %v474_v55 = vmul.f32 0.6931472, %v642_v41  ;;  %v501_v61 = vmul.f32 %v470_v47, %v437_v10  ;;  %v467_v4 = vadd.f32 1e-10, %v1088_v59 }
  0x28   :  { %v646_v51 = vpop.eup %645  ;;  %v476_v56 = vmul.f32 0.6931472, %v644_v46  ;;  %v502_v22 = vmul.f32 %v472_v48, %v438_v11  ;;  %663 = vlog2.f32 %v466_v53 }
  0x29   :  { %136 = vadd.xlane.f32.xlu0 %v135_v9  ;;  %v478_v60 = vmul.f32 0.6931472, %v646_v51  ;;  %v648_v62 = vpop.eup %647  ;;  %v503_v63 = vmul.f32 %v474_v55, %v439_v13  ;;  %v517_v9 = vsel %vm104_vm0, %v501_v61, 0.0  ;;  %665 = vlog2.f32 %v467_v4 }
  0x2a   :  { %v504_v36 = vmul.f32 %v476_v56, %v440_v17  ;;  %v480_v8 = vmul.f32 0.6931472, %v648_v62  ;;  %v650_v15 = vpop.eup %649  ;;  %v518_v19 = vsel %vm104_vm0, %v502_v22, 0.0  ;;  %667 = vlog2.f32 %v468_v31 }
  0x2b   :  { %v505_v16 = vmul.f32 %v478_v60, %v441_v21  ;;  %v520_v27 = vsel %vm104_vm0, %v503_v63, 0.0  ;;  %v482_v1 = vmul.f32 0.6931472, %v650_v15  ;;  %v519_v10 = vadd.f32 %v518_v19, %v517_v9  ;;  %v652_v17 = vpop.eup %651 }
  0x2c   :  { %v506_v11 = vmul.f32 %v480_v8, %v442_v28  ;;  %v522_v13 = vsel %vm104_vm0, %v504_v36, 0.0  ;;  %v654_v7 = vpop.eup %653  ;;  %v484_v35 = vmul.f32 0.6931472, %v652_v17 }
  0x2d   :  { %v521_v32 = vadd.f32 %v520_v27, %v519_v10  ;;  %v507_v39 = vmul.f32 %v482_v1, %v443_v0  ;;  %v524_v21 = vsel %vm104_vm0, %v505_v16, 0.0  ;;  %v656_v40 = vpop.eup %655  ;;  %v486_v41 = vmul.f32 0.6931472, %v654_v7 }
  0x2e   :  { %v658_v45 = vpop.eup %657  ;;  %v488_v52 = vmul.f32 0.6931472, %v656_v40  ;;  %v508_v46 = vmul.f32 %v484_v35, %v1062_v2  ;;  %v526_v28 = vsel %vm104_vm0, %v506_v11, 0.0 }
  0x2f   :  { %v523_v44 = vadd.f32 %v522_v13, %v521_v32  ;;  %v660_v14 = vpop.eup %659  ;;  %v490_v48 = vmul.f32 0.6931472, %v658_v45  ;;  %v509_v51 = vmul.f32 %v486_v41, %v1065_v6  ;;  %v528_v53 = vsel %vm104_vm0, %v507_v39, 0.0 }
  0x30   :  { %v662_v0 = vpop.eup %661  ;;  %v492_v56 = vmul.f32 0.6931472, %v660_v14  ;;  %v510_v60 = vmul.f32 %v488_v52, %v1069_v18  ;;  %v530_v61 = vsel %vm104_vm0, %v508_v46, 0.0 }
  0x31   :  { %v525_v47 = vadd.f32 %v524_v21, %v523_v44  ;;  %v494_v63 = vmul.f32 0.6931472, %v662_v0  ;;  %v511_v2 = vmul.f32 %v490_v48, %v1072_v37  ;;  %v532_v36 = vsel %vm104_vm0, %v509_v51, 0.0 }
  0x32   :  { %v664_v22 = vpop.eup %663  ;;  %v512_v6 = vmul.f32 %v492_v56, %v1075_v26  ;;  %v534_v15 = vsel %vm104_vm0, %v510_v60, 0.0  ;;  %v799_v44 = vmov 0  }
  0x33   :  { %v527_v55 = vadd.f32 %v526_v28, %v525_v47  ;;  %v666_v4 = vpop.eup %665  ;;  %v496_v9 = vmul.f32 0.6931472, %v664_v22  ;;  %v513_v18 = vmul.f32 %v494_v63, %v1078_v30  ;;  %v536_v31 = vsel %vm104_vm0, %v511_v2, 0.0  ;;  %636 = vset.pattern.permute.xlu0 %v799_v44  ;;  %635 = vset.pattern.permute.xlu1 %v799_v44  ;;  %v228_v28 = vld [vmem:[%s1458_s1] sm:$0xff] }
  0x34   :  { %v668_v16 = vpop.eup %667  ;;  %v498_v27 = vmul.f32 0.6931472, %v666_v4  ;;  %v538_v11 = vsel %vm104_vm0, %v512_v6, 0.0  ;;  %v244_v47 = vmul.f32 0.01, %v228_v28 }
  0x35   :  { %v529_v62 = vadd.f32 %v528_v53, %v527_v55  ;;  %v500_v10 = vmul.f32 0.6931472, %v668_v16  ;;  %v514_v37 = vmul.f32 %v496_v9, %v1081_v38  ;;  %v540_v26 = vsel %vm104_vm0, %v513_v18, 0.0 }
  0x36   :  { %v515_v17 = vmul.f32 %v498_v27, %v1088_v59  ;;  %v161_v63 = vadd.f32 1e-05, %v1046_v58  ;;  %v148_v2 = vadd.f32 1e-05, %v906_v25  ;;  %v149_v9 = vadd.f32 1e-05, %v914_v29 }
  0x37   :  { %v531_v8 = vadd.f32 %v530_v61, %v529_v62  ;;  %v516_v7 = vmul.f32 %v500_v10, %v1091_v5  ;;  %v542_v35 = vsel %vm104_vm0, %v514_v37, 0.0  ;;  %v196_v5 = vld [vmem:[%s1460_s3] sm:$0xff]  ;;  %v160_v62 = vadd.f32 1e-05, %v1042_v54 }
  0x38   :  { %v544_v30 = vsel %vm104_vm0, %v515_v17, 0.0  ;;  %v212_v14 = vmul.f32 0.99, %v196_v5  ;;  %v150_v6 = vadd.f32 1e-05, %v924_v33 }
  0x39   :  { %v533_v19 = vadd.f32 %v532_v36, %v531_v8  ;;  %v546_v40 = vsel %vm104_vm0, %v516_v7, 0.0  ;;  %v146_v36 = vadd.f32 1e-05, %v902_v23  ;;  %v147_v8 = vadd.f32 1e-05, %v904_v24 }
  0x3a   :  { %v1128_v51 = vadd.f32 %v244_v47, %v212_v14  ;;  %v152_v16 = vadd.f32 1e-05, %v955_v50  ;;  %v154_v54 = vadd.f32 1e-05, %v981_v3  ;;  %v155_v58 = vadd.f32 1e-05, %v994_v12 }
  0x3b   :  { %v535_v1 = vadd.f32 %v534_v15, %v533_v19  ;;  %v151_v15 = vadd.f32 1e-05, %v942_v43  ;;  %v153_v19 = vadd.f32 1e-05, %v968_v57  ;;  %v156_v25 = vadd.f32 1e-05, %v1007_v20 }
  0x3c   :  { %293 = vst.msk [vmem:[#allocation4] sm:$0xff] %vm292_vm1, %v1128_v51  ;;  %v157_v27 = vadd.f32 1e-05, %v1020_v34  ;;  %v158_v24 = vadd.f32 1e-05, %v1033_v42  ;;  %v198_v14 = vld [vmem:[%s1460_s3 + $0x10] sm:$0xff] }
  0x3d   :  { %v537_v13 = vadd.f32 %v536_v31, %v535_v1  ;;  %v159_v29 = vadd.f32 1e-05, %v1038_v49  ;;  %v230_v47 = vld [vmem:[%s1458_s1 + $0x10] sm:$0xff] }
  0x3f   :  { %v539_v32 = vadd.f32 %v538_v11, %v537_v13 }
  0x41   :  { %v541_v39 = vadd.f32 %v540_v26, %v539_v32 }
  0x43   :  { %v543_v21 = vadd.f32 %v542_v35, %v541_v39 }
  0x45   :  { %v545_v41 = vadd.f32 %v544_v30, %v543_v21 }
  0x47   :  { %v547_v38 = vadd.f32 %v546_v40, %v545_v41 }
  0x49   :  { %548 = vadd.xlane.f32.xlu0 %v547_v38 }
  0xb6   :  { %v137_v59 = vpop.xlane.xlu0 %136 }
  0xb7   :  { %v138_v45 = vrot.slane %v137_v59, 4 }
  0xb9   :  { %v139_v52 = vadd.f32 %v138_v45, %v137_v59 }
  0xbb   :  { %v140_v46 = vrot.slane %v139_v52, 2 }
  0xbd   :  { %v141_v48 = vadd.f32 %v140_v46, %v139_v52 }
  0xbf   :  { %v142_v53 = vrot.slane %v141_v48, 1 }
  0xc1   :  { %v143_v0 = vadd.f32 %v142_v53, %v141_v48  ;;  %v214_v48 = vmul.f32 0.99, %v198_v14  ;;  %v246_v53 = vmul.f32 0.01, %v230_v47 }
  0xc3   :  { %624 = vpush %v143_v0  ;;  %v197_v0 = vld [vmem:[%s1460_s3 + $0x8] sm:$0xff] }
  0xd6   :  { %v549_v60 = vpop.xlane.xlu0 %548 }
  0xd7   :  { %v550_v61 = vrot.slane %v549_v60, 4 }
  0xd9   :  { %v551_v22 = vadd.f32 %v550_v61, %v549_v60  ;;  %v213_v60 = vmul.f32 0.99, %v197_v0  ;;  %v209_v0 = vld [vmem:[%s1460_s3 + $0x68] sm:$0xff] }
  0xdb   :  { %v552_v4 = vrot.slane %v551_v22, 2 }
  0xdd   :  { %v553_v33 = vadd.f32 %v552_v4, %v551_v22  ;;  %v210_v22 = vld [vmem:[%s1460_s3 + $0x70] sm:$0xff]  ;;  %v199_v4 = vld [vmem:[%s1460_s3 + $0x18] sm:$0xff] }
  0xdf   :  { %v554_v7 = vrot.slane %v553_v33, 1 }
  0xe1   :  { %v555_v28 = vadd.f32 %v554_v7, %v553_v33 }
  0xe3   :  { %626 = vpush %v555_v28  ;;  %v240_v28 = vld [vmem:[%s1458_s1 + $0x60] sm:$0xff] }
  0xe4   :  { %v256_v47 = vmul.f32 0.01, %v240_v28 }
  0xf4   :  { %s625_s21 = spop %624 }
  0xf5   :  { %v1132_v55 = vstv %s625_s21 }
  0xf6   :  { %v162_v56 = vadd.f32 0.00128, %v1132_v55 }
  0xf8   :  { %669 = vrcp.f32 %v162_v56  ;;  %v1216_v56 = vadd.f32 %v246_v53, %v214_v48 }
  0xfa   :  { %295 = vst.msk [vmem:[#allocation4 + $0x10] sm:$0xff] %vm292_vm1, %v1216_v56 }
 0x102   :  { %v670_v23 = vpop.eup %669 }
 0x103   :  { %v166_v18 = vmul.f32 %v670_v23, %v148_v2  ;;  %v164_v43 = vmul.f32 %v670_v23, %v146_v36  ;;  %v178_v31 = vmul.f32 %v670_v23, %v160_v62  ;;  %v165_v50 = vmul.f32 %v670_v23, %v147_v8  ;;  %v242_v62 = vld [vmem:[%s1458_s1 + $0x70] sm:$0xff]  ;;  %v231_v8 = vld [vmem:[%s1458_s1 + $0x18] sm:$0xff] }
 0x104   :  { %v167_v1 = vmul.f32 %v670_v23, %v149_v9  ;;  %v168_v57 = vmul.f32 %v670_v23, %v150_v6  ;;  %v169_v10 = vmul.f32 %v670_v23, %v151_v15  ;;  %v170_v3 = vmul.f32 %v670_v23, %v152_v16 }
 0x105   :  { %v182_v12 = vmul.f32 %v166_v18, %v1132_v55  ;;  %v180_v20 = vmul.f32 %v164_v43, %v1132_v55  ;;  %v194_v37 = vmul.f32 %v178_v31, %v1132_v55  ;;  %v181_v34 = vmul.f32 %v165_v50, %v1132_v55  ;;  %v202_v43 = vld [vmem:[%s1460_s3 + $0x30] sm:$0xff] }
 0x106   :  { %v183_v42 = vmul.f32 %v167_v1, %v1132_v55  ;;  %v184_v49 = vmul.f32 %v168_v57, %v1132_v55  ;;  %v185_v11 = vmul.f32 %v169_v10, %v1132_v55  ;;  %v1159_v13 = vmul.f32 %v170_v3, %v1132_v55  ;;  %v234_v31 = vld [vmem:[%s1458_s1 + $0x30] sm:$0xff]  ;;  %v203_v10 = vld [vmem:[%s1460_s3 + $0x38] sm:$0xff] }
 0x107   :  { %321 = vperm.xlu0 %636, %v182_v12   ;;  %278 = vst.msk [vmem:[#allocation2 + $0x10] sm:$0xff] %vm104_vm0, %v182_v12  ;;  %311 = vperm.xlu1 %635, %v180_v20   ;;  %276 = vst.msk [vmem:[#allocation2] sm:$0xff] %vm104_vm0, %v180_v20  ;;  %v171_v17 = vmul.f32 %v670_v23, %v153_v19  ;;  %v172_v26 = vmul.f32 %v670_v23, %v154_v54  ;;  %v226_v2 = vmul.f32 0.99, %v210_v22  ;;  %v200_v19 = vld [vmem:[%s1460_s3 + $0x20] sm:$0xff]  ;;  %v235_v3 = vld [vmem:[%s1458_s1 + $0x38] sm:$0xff] }
 0x108   :  { %290 = vst.msk [vmem:[#allocation2 + $0x70] sm:$0xff] %vm104_vm0, %v194_v37  ;;  %277 = vst.msk [vmem:[#allocation2 + $0x8] sm:$0xff] %vm104_vm0, %v181_v34  ;;  %v173_v32 = vmul.f32 %v670_v23, %v155_v58  ;;  %v174_v35 = vmul.f32 %v670_v23, %v156_v25  ;;  %v175_v39 = vmul.f32 %v670_v23, %v157_v27  ;;  %v258_v36 = vmul.f32 0.01, %v242_v62  ;;  %v232_v54 = vld [vmem:[%s1458_s1 + $0x20] sm:$0xff]  ;;  %v201_v27 = vld [vmem:[%s1460_s3 + $0x28] sm:$0xff] }
 0x109   :  { %279 = vst.msk [vmem:[#allocation2 + $0x18] sm:$0xff] %vm104_vm0, %v183_v42  ;;  %280 = vst.msk [vmem:[#allocation2 + $0x20] sm:$0xff] %vm104_vm0, %v184_v49  ;;  %v176_v30 = vmul.f32 %v670_v23, %v158_v24  ;;  %v177_v21 = vmul.f32 %v670_v23, %v159_v29  ;;  %v187_v40 = vmul.f32 %v171_v17, %v1132_v55  ;;  %v215_v6 = vmul.f32 0.99, %v199_v4  ;;  %v233_v24 = vld [vmem:[%s1458_s1 + $0x28] sm:$0xff] }
 0x10a   :  { %281 = vst.msk [vmem:[#allocation2 + $0x28] sm:$0xff] %vm104_vm0, %v185_v11  ;;  %282 = vst.msk [vmem:[#allocation2 + $0x30] sm:$0xff] %vm104_vm0, %v1159_v13  ;;  %v188_v41 = vmul.f32 %v172_v26, %v1132_v55  ;;  %v1173_v38 = vmul.f32 %v173_v32, %v1132_v55  ;;  %v179_v44 = vmul.f32 %v670_v23, %v161_v63  ;;  %v247_v15 = vmul.f32 0.01, %v231_v8  ;;  %v205_v17 = vld [vmem:[%s1460_s3 + $0x48] sm:$0xff] }
 0x10b   :  { %v1176_v59 = vmul.f32 %v174_v35, %v1132_v55  ;;  %v1179_v45 = vmul.f32 %v175_v39, %v1132_v55  ;;  %v1182_v52 = vmul.f32 %v176_v30, %v1132_v55  ;;  %v1185_v46 = vmul.f32 %v177_v21, %v1132_v55  ;;  %381 = vperm.xlu0 %636, %v194_v37   ;;  %v237_v26 = vld [vmem:[%s1458_s1 + $0x48] sm:$0xff]  ;;  %v206_v39 = vld [vmem:[%s1460_s3 + $0x50] sm:$0xff] }
 0x10c   :  { %316 = vperm.xlu1 %635, %v181_v34   ;;  %283 = vst.msk [vmem:[#allocation2 + $0x38] sm:$0xff] %vm104_vm0, %v187_v40  ;;  %284 = vst.msk [vmem:[#allocation2 + $0x40] sm:$0xff] %vm104_vm0, %v188_v41  ;;  %v1192_v5 = vmul.f32 %v179_v44, %v1132_v55  ;;  %v229_v55 = vld [vmem:[%s1458_s1 + $0x8] sm:$0xff]  ;;  %v1236_v9 = vadd.f32 %v258_v36, %v226_v2  ;;  %v1241_v16 = vadd.f32 %v247_v15, %v215_v6  ;;  %v204_v34 = vld [vmem:[%s1460_s3 + $0x40] sm:$0xff] }
 0x10d   :  { %285 = vst.msk [vmem:[#allocation2 + $0x48] sm:$0xff] %vm104_vm0, %v1173_v38  ;;  %286 = vst.msk [vmem:[#allocation2 + $0x50] sm:$0xff] %vm104_vm0, %v1176_v59  ;;  %v245_v61 = vmul.f32 0.01, %v229_v55  ;;  %v216_v58 = vmul.f32 0.99, %v200_v19 }
 0x10e   :  { %287 = vst.msk [vmem:[#allocation2 + $0x58] sm:$0xff] %vm104_vm0, %v1179_v45  ;;  %288 = vst.msk [vmem:[#allocation2 + $0x60] sm:$0xff] %vm104_vm0, %v1182_v52  ;;  %v248_v25 = vmul.f32 0.01, %v232_v54  ;;  %v217_v29 = vmul.f32 0.99, %v201_v27 }
 0x10f   :  { %289 = vst.msk [vmem:[#allocation2 + $0x68] sm:$0xff] %vm104_vm0, %v1185_v46  ;;  %291 = vst.msk [vmem:[#allocation2 + $0x78] sm:$0xff] %vm104_vm0, %v1192_v5  ;;  %v1226_v63 = vadd.f32 %v245_v61, %v213_v60  ;;  %v249_v33 = vmul.f32 0.01, %v233_v24  ;;  %v218_v50 = vmul.f32 0.99, %v202_v43 }
 0x110   :  { %326 = vperm.xlu1 %635, %v183_v42   ;;  %307 = vst.msk [vmem:[#allocation4 + $0x70] sm:$0xff] %vm292_vm1, %v1236_v9  ;;  %296 = vst.msk [vmem:[#allocation4 + $0x18] sm:$0xff] %vm292_vm1, %v1241_v16  ;;  %v1251_v23 = vadd.f32 %v248_v25, %v216_v58  ;;  %v250_v1 = vmul.f32 0.01, %v234_v31  ;;  %v219_v12 = vmul.f32 0.99, %v203_v10 }
 0x111   :  { %294 = vst.msk [vmem:[#allocation4 + $0x8] sm:$0xff] %vm292_vm1, %v1226_v63  ;;  %v1261_v18 = vadd.f32 %v249_v33, %v217_v29  ;;  %v251_v20 = vmul.f32 0.01, %v235_v3  ;;  %v236_v42 = vld [vmem:[%s1458_s1 + $0x40] sm:$0xff]  ;;  %v221_v32 = vmul.f32 0.99, %v205_v17 }
 0x112   :  { %297 = vst.msk [vmem:[#allocation4 + $0x20] sm:$0xff] %vm292_vm1, %v1251_v23  ;;  %v1272_v57 = vadd.f32 %v250_v1, %v218_v50  ;;  %v253_v7 = vmul.f32 0.01, %v237_v26  ;;  %v238_v30 = vld [vmem:[%s1458_s1 + $0x50] sm:$0xff]  ;;  %v222_v21 = vmul.f32 0.99, %v206_v39 }
 0x113   :  { %298 = vst.msk [vmem:[#allocation4 + $0x28] sm:$0xff] %vm292_vm1, %v1261_v18  ;;  %v1283_v37 = vadd.f32 %v251_v20, %v219_v12  ;;  %v239_v44 = vld [vmem:[%s1458_s1 + $0x58] sm:$0xff]  ;;  %v241_v55 = vld [vmem:[%s1458_s1 + $0x68] sm:$0xff]  ;;  %v225_v60 = vmul.f32 0.99, %v209_v0 }
 0x114   :  { %331 = vperm.xlu1 %635, %v184_v49   ;;  %299 = vst.msk [vmem:[#allocation4 + $0x30] sm:$0xff] %vm292_vm1, %v1272_v57  ;;  %v220_v49 = vmul.f32 0.99, %v204_v34  ;;  %v1305_v35 = vadd.f32 %v253_v7, %v221_v32  ;;  %s627_s24 = spop %626  ;;  %v257_v61 = vmul.f32 0.01, %v241_v55  ;;  %v211_v2 = vld [vmem:[%s1460_s3 + $0x78] sm:$0xff] }
 0x115   :  { %300 = vst.msk [vmem:[#allocation4 + $0x38] sm:$0xff] %vm292_vm1, %v1283_v37  ;;  %v557_v48 = vstv %s627_s24  ;;  %v243_v36 = vld [vmem:[%s1458_s1 + $0x78] sm:$0xff]  ;;  %v227_v4 = vmul.f32 0.99, %v211_v2 }
 0x116   :  { %302 = vst.msk [vmem:[#allocation4 + $0x48] sm:$0xff] %vm292_vm1, %v1305_v35  ;;  %v1347_v62 = vadd.f32 %v257_v61, %v225_v60  ;;  %v259_v8 = vmul.f32 0.01, %v243_v36 }
 0x118   :  { %336 = vperm.xlu1 %635, %v185_v11   ;;  %v252_v11 = vmul.f32 0.01, %v236_v42  ;;  %306 = vst.msk [vmem:[#allocation4 + $0x68] sm:$0xff] %vm292_vm1, %v1347_v62  ;;  %v1357_v6 = vadd.f32 %v259_v8, %v227_v4 }
 0x11a   :  { %308 = vst.msk [vmem:[#allocation4 + $0x78] sm:$0xff] %vm292_vm1, %v1357_v6 }
 0x11c   :  { %341 = vperm.xlu1 %635, %v1159_v13   ;;  %v1294_v13 = vadd.f32 %v252_v11, %v220_v49 }
 0x11e   :  { %301 = vst.msk [vmem:[#allocation4 + $0x40] sm:$0xff] %vm292_vm1, %v1294_v13 }
 0x120   :  { %346 = vperm.xlu1 %635, %v187_v40   ;;  %v254_v40 = vmul.f32 0.01, %v238_v30 }
 0x124   :  { %351 = vperm.xlu1 %635, %v188_v41   ;;  %v1316_v41 = vadd.f32 %v254_v40, %v222_v21 }
 0x126   :  { %303 = vst.msk [vmem:[#allocation4 + $0x50] sm:$0xff] %vm292_vm1, %v1316_v41 }
 0x128   :  { %356 = vperm.xlu1 %635, %v1173_v38   ;;  %v207_v38 = vld [vmem:[%s1460_s3 + $0x58] sm:$0xff] }
 0x12c   :  { %361 = vperm.xlu1 %635, %v1176_v59   ;;  %v223_v59 = vmul.f32 0.99, %v207_v38 }
 0x130   :  { %366 = vperm.xlu1 %635, %v1179_v45   ;;  %v255_v45 = vmul.f32 0.01, %v239_v44 }
 0x134   :  { %371 = vperm.xlu1 %635, %v1182_v52   ;;  %v1327_v52 = vadd.f32 %v255_v45, %v223_v59 }
 0x136   :  { %304 = vst.msk [vmem:[#allocation4 + $0x58] sm:$0xff] %vm292_vm1, %v1327_v52 }
 0x138   :  { %376 = vperm.xlu1 %635, %v1185_v46   ;;  %v208_v46 = vld [vmem:[%s1460_s3 + $0x60] sm:$0xff]  ;;  %s705_s3 = scalar_lea.vmem %s581_s11, 2048 }
 0x139   :  { %v224_v14 = vmul.f32 0.99, %v208_v46  ;;  %p706_p0 = scmp.ne.s32.totalorder %s581_s11, %s705_s3  ;;  %p711_p2 = scmp.lt.s32.totalorder %s705_s3, %s705_s3 }
 0x13b   :  { %v1337_v53 = vadd.f32 %v256_v47, %v224_v14  ;;  %p712_p3 = por %p711_p2, %p710_p1 }
 0x13c   :  { %386 = vperm.xlu1 %635, %v1192_v5   ;;  %v558_v5 = vsub.f32 0.0, %v557_v48 }
 0x13d   :  { %305 = vst.msk [vmem:[#allocation4 + $0x60] sm:$0xff] %vm292_vm1, %v1337_v53  ;;  %p713_p4 = pnand %p712_p3, %p706_p0 }
 0x13e   :  { %v559_v22 = vmul.f32 1.442695, %v558_v5 }
 0x140   :  { %671 = vpow2.f32 %v559_v22 }
 0x141   :  { %716 = shalt.err (!%p713_p4)
}
 0x142   :  { %s717_s15 = scalar_lea.hbm %s1462_s5, 2048 }
 0x143   :  { %p718_p5 = scmp.ne.s32.totalorder %s1462_s5, %s717_s15  ;;  %p721_p6 = scmp.lt.u32.totalorder %s717_s15, %s1462_s5 }
 0x145   :  { %p723_p7 = pnand %p721_p6, %p718_p5 }
 0x147   :  { %726 = shalt.err (!%p723_p7)
}
 0x148   :  { %s802_s2 = smov 128   ;;  %s803_s19 = smov 8   ;;  %vm561_vm2 = vcmask 0  }
 0x149   :  { %586 = dma.vmem_to_hbm [thread:$0]  %s581_s11, 2048, %s1462_s5, [#allocation5], %s802_s2, %s802_s2, %s803_s19  }
 0x14a   :  { %s727_s22 = scalar_lea.vmem %s1361_s13, 2048  ;;  %p732_p9 = scmp.lt.s32.totalorder %s1361_s13, %s1361_s13 }
 0x14b   :  { %p728_p8 = scmp.ne.s32.totalorder %s1361_s13, %s727_s22  ;;  %p733_p10 = scmp.lt.s32.totalorder %s727_s22, %s727_s22 }
 0x14d   :  { %p734_p11 = por %p733_p10, %p732_p9 }
 0x14f   :  { %p735_p12 = pnand %p734_p11, %p728_p8 }
 0x151   :  { %738 = shalt.err (!%p735_p12)
}
 0x152   :  { %s739_s25 = scalar_lea.hbm %s1461_s4, 2048 }
 0x153   :  { %p740_p13 = scmp.ne.s32.totalorder %s1461_s4, %s739_s25  ;;  %p743_p0 = scmp.lt.u32.totalorder %s739_s25, %s1461_s4 }
 0x155   :  { %p745_p1 = pnand %p743_p0, %p740_p13 }
 0x157   :  { %748 = shalt.err (!%p745_p1)
}
 0x158   :  { %574 = dma.vmem_to_hbm [thread:$0]  %s1361_s13, 2048, %s1461_s4, [#allocation3], %s802_s2, %s802_s2, %s803_s19   ;;  %v672_v15 = vpop.eup %671 }
 0x159   :  { %562 = vst.msk [vmem:[#allocation7] sm:$0x1] %vm561_vm2, %v672_v15  ;;  %s804_s8 = smov [#allocation7]  }
 0x15a   :  { %s605_s9 = sshll.u32 %s804_s8, 4  ;;  %s606_s9 = int_to_ptr.vmem [resolvable:$true] %s605_s9 }
 0x15b   :  { %s749_s10 = scalar_lea.vmem %s606_s9, 16  ;;  %s753_s11 = scalar_lea.vmem %s606_s9, 32 }
 0x15c   :  { %p750_p2 = scmp.ne.s32.totalorder %s606_s9, %s749_s10  ;;  %p754_p3 = scmp.lt.s32.totalorder %s606_s9, %s606_s9 }
 0x15d   :  { %p755_p4 = scmp.lt.s32.totalorder %s753_s11, %s749_s10 }
 0x15f   :  { %p756_p5 = por %p755_p4, %p754_p3 }
 0x161   :  { %p757_p6 = pnand %p756_p5, %p750_p2 }
 0x163   :  { %760 = shalt.err (!%p757_p6)
}
 0x164   :  { %s761_s1 = scalar_lea.hbm %s1464_s7, 16 }
 0x165   :  { %p762_p7 = scmp.ne.s32.totalorder %s1464_s7, %s761_s1  ;;  %p765_p8 = scmp.lt.u32.totalorder %s761_s1, %s1464_s7 }
 0x167   :  { %p767_p9 = pnand %p765_p8, %p762_p7 }
 0x169   :  { %770 = shalt.err (!%p767_p9)
}
 0x16a   :  { %608 = dma.vmem_to_hbm [thread:$0]  %s606_s9, 16, %s1464_s7, [#allocation8]  }
 0x16b   :  { %s805_s7 = smov [#allocation6]  }
 0x16c   :  { %s592_s18 = sshll.u32 %s805_s7, 4  ;;  %s593_s18 = int_to_ptr.vmem [resolvable:$true] %s592_s18 }
 0x16d   :  { %s771_s0 = scalar_lea.vmem %s593_s18, 2048  ;;  %p776_p11 = scmp.lt.s32.totalorder %s593_s18, %s593_s18 }
 0x16e   :  { %p772_p10 = scmp.ne.s32.totalorder %s593_s18, %s771_s0  ;;  %p777_p12 = scmp.lt.s32.totalorder %s771_s0, %s771_s0 }
 0x170   :  { %p778_p13 = por %p777_p12, %p776_p11 }
 0x172   :  { %p779_p0 = pnand %p778_p13, %p772_p10 }
 0x186   :  { %v312_v19 = vpop.permute.xlu1 %311  ;;  %v322_v54 = vpop.permute.xlu0 %321 }
 0x187   :  { %673 = vrcp.f32 %v312_v19 }
 0x188   :  { %675 = vrcp.f32 %v322_v54 }
 0x18a   :  { %v382_v25 = vpop.permute.xlu0 %381 }
 0x18b   :  { %v317_v58 = vpop.permute.xlu1 %316 }
 0x18c   :  { %677 = vrcp.f32 %v317_v58 }
 0x18d   :  { %679 = vrcp.f32 %v382_v25 }
 0x18f   :  { %v327_v27 = vpop.permute.xlu1 %326 }
 0x190   :  { %681 = vrcp.f32 %v327_v27 }
 0x191   :  { %v674_v24 = vpop.eup %673 }
 0x192   :  { %v676_v29 = vpop.eup %675  ;;  %v390_v33 = vmul.f32 %v674_v24, %v1128_v51 }
 0x193   :  { %v332_v43 = vpop.permute.xlu1 %331  ;;  %v394_v31 = vmul.f32 %v676_v29, %v1216_v56 }
 0x194   :  { %683 = vrcp.f32 %v332_v43  ;;  %421 = vst.msk [vmem:[#allocation6] sm:$0xff] %vm292_vm1, %v390_v33 }
 0x195   :  { %423 = vst.msk [vmem:[#allocation6 + $0x10] sm:$0xff] %vm292_vm1, %v394_v31 }
 0x196   :  { %v678_v50 = vpop.eup %677 }
 0x197   :  { %v680_v1 = vpop.eup %679  ;;  %v392_v10 = vmul.f32 %v678_v50, %v1226_v63  ;;  %v337_v3 = vpop.permute.xlu1 %336 }
 0x198   :  { %v418_v12 = vmul.f32 %v680_v1, %v1236_v9  ;;  %685 = vrcp.f32 %v337_v3 }
 0x199   :  { %422 = vst.msk [vmem:[#allocation6 + $0x8] sm:$0xff] %vm292_vm1, %v392_v10 }
 0x19a   :  { %v682_v20 = vpop.eup %681  ;;  %435 = vst.msk [vmem:[#allocation6 + $0x70] sm:$0xff] %vm292_vm1, %v418_v12 }
 0x19b   :  { %v396_v51 = vmul.f32 %v682_v20, %v1241_v16  ;;  %v342_v56 = vpop.permute.xlu1 %341 }
 0x19c   :  { %687 = vrcp.f32 %v342_v56 }
 0x19d   :  { %424 = vst.msk [vmem:[#allocation6 + $0x18] sm:$0xff] %vm292_vm1, %v396_v51 }
 0x19e   :  { %v684_v34 = vpop.eup %683 }
 0x19f   :  { %v398_v42 = vmul.f32 %v684_v34, %v1251_v23  ;;  %v347_v49 = vpop.permute.xlu1 %346 }
 0x1a0   :  { %689 = vrcp.f32 %v347_v49 }
 0x1a1   :  { %425 = vst.msk [vmem:[#allocation6 + $0x20] sm:$0xff] %vm292_vm1, %v398_v42 }
 0x1a2   :  { %v686_v63 = vpop.eup %685 }
 0x1a3   :  { %v400_v9 = vmul.f32 %v686_v63, %v1261_v18  ;;  %v352_v11 = vpop.permute.xlu1 %351 }
 0x1a4   :  { %691 = vrcp.f32 %v352_v11 }
 0x1a5   :  { %426 = vst.msk [vmem:[#allocation6 + $0x28] sm:$0xff] %vm292_vm1, %v400_v9 }
 0x1a6   :  { %v688_v17 = vpop.eup %687 }
 0x1a7   :  { %v402_v16 = vmul.f32 %v688_v17, %v1272_v57  ;;  %v357_v26 = vpop.permute.xlu1 %356 }
 0x1a8   :  { %693 = vrcp.f32 %v357_v26 }
 0x1a9   :  { %427 = vst.msk [vmem:[#allocation6 + $0x30] sm:$0xff] %vm292_vm1, %v402_v16 }
 0x1aa   :  { %v690_v32 = vpop.eup %689 }
 0x1ab   :  { %v404_v23 = vmul.f32 %v690_v32, %v1283_v37  ;;  %v362_v7 = vpop.permute.xlu1 %361 }
 0x1ac   :  { %695 = vrcp.f32 %v362_v7 }
 0x1ad   :  { %428 = vst.msk [vmem:[#allocation6 + $0x38] sm:$0xff] %vm292_vm1, %v404_v23 }
 0x1ae   :  { %v692_v39 = vpop.eup %691 }
 0x1af   :  { %v406_v18 = vmul.f32 %v692_v39, %v1294_v13  ;;  %v367_v30 = vpop.permute.xlu1 %366 }
 0x1b0   :  { %697 = vrcp.f32 %v367_v30 }
 0x1b1   :  { %429 = vst.msk [vmem:[#allocation6 + $0x40] sm:$0xff] %vm292_vm1, %v406_v18 }
 0x1b2   :  { %v694_v21 = vpop.eup %693 }
 0x1b3   :  { %v408_v57 = vmul.f32 %v694_v21, %v1305_v35  ;;  %v372_v40 = vpop.permute.xlu1 %371 }
 0x1b4   :  { %699 = vrcp.f32 %v372_v40 }
 0x1b5   :  { %430 = vst.msk [vmem:[#allocation6 + $0x48] sm:$0xff] %vm292_vm1, %v408_v57 }
 0x1b6   :  { %v696_v38 = vpop.eup %695 }
 0x1b7   :  { %v410_v37 = vmul.f32 %v696_v38, %v1316_v41  ;;  %v377_v44 = vpop.permute.xlu1 %376 }
 0x1b8   :  { %701 = vrcp.f32 %v377_v44 }
 0x1b9   :  { %431 = vst.msk [vmem:[#allocation6 + $0x50] sm:$0xff] %vm292_vm1, %v410_v37 }
 0x1ba   :  { %v698_v59 = vpop.eup %697 }
 0x1bb   :  { %v412_v13 = vmul.f32 %v698_v59, %v1327_v52  ;;  %v387_v45 = vpop.permute.xlu1 %386 }
 0x1bc   :  { %703 = vrcp.f32 %v387_v45 }
 0x1bd   :  { %432 = vst.msk [vmem:[#allocation6 + $0x58] sm:$0xff] %vm292_vm1, %v412_v13 }
 0x1be   :  { %v700_v46 = vpop.eup %699 }
 0x1bf   :  { %v414_v35 = vmul.f32 %v700_v46, %v1337_v53 }
 0x1c1   :  { %433 = vst.msk [vmem:[#allocation6 + $0x60] sm:$0xff] %vm292_vm1, %v414_v35 }
 0x1c2   :  { %v702_v28 = vpop.eup %701 }
 0x1c3   :  { %v416_v14 = vmul.f32 %v702_v28, %v1347_v62 }
 0x1c5   :  { %434 = vst.msk [vmem:[#allocation6 + $0x68] sm:$0xff] %vm292_vm1, %v416_v14 }
 0x1c6   :  { %v704_v41 = vpop.eup %703 }
 0x1c7   :  { %v420_v47 = vmul.f32 %v704_v41, %v1357_v6 }
 0x1c9   :  { %436 = vst.msk [vmem:[#allocation6 + $0x78] sm:$0xff] %vm292_vm1, %v420_v47 }
 0x1ca   :  { %782 = shalt.err (!%p779_p0)
}
 0x1cb   :  { %s783_s22 = scalar_lea.hbm %s1463_s6, 2048 }
 0x1cc   :  { %p784_p1 = scmp.ne.s32.totalorder %s1463_s6, %s783_s22  ;;  %p787_p2 = scmp.lt.u32.totalorder %s783_s22, %s1463_s6 }
 0x1ce   :  { %p789_p3 = pnand %p787_p2, %p784_p1 }
 0x1d0   :  { %792 = shalt.err (!%p789_p3)
}
 0x1d1   :  { %598 = dma.vmem_to_hbm [thread:$0]  %s593_s18, 2048, %s1463_s6, [#allocation5], %s802_s2, %s802_s2, %s803_s19  }
 0x1d2   :  { %793 = dma.done.wait [#allocation3], 2048  }
 0x1d3   :  { %794 = vsyncadd [#allocation3], 4294965248 }
 0x1d4   :  { %795 = dma.done.wait [#allocation5], 4096  }
 0x1d5   :  { %796 = vsyncadd [#allocation5], 4294963200 }
 0x1d6   :  { %797 = dma.done.wait [#allocation8], 16  }
 0x1d7   :  { %798 = vsyncadd [#allocation8], 4294967280 }
 0x1d8   :  { %621 = vsyncpa [#allocation3], 1 }
 0x1d9   :  { %622 = vsyncpa [#allocation5], 1 }
 0x1da   :  { %623 = vsyncpa [#allocation8], 1 }

// kernel: vector_quantizer_ema_forward.3
= control target key start
LH: loop header
LB: loop body
LE: loop exit
PB: predicated region body
PF: predicated region fallthrough
CT: control target
= control target key end

     0   :  { %13 = vsyncpa [#allocation5], 0  ;;  %s1390_s0 = inlined_call_operand.hbm [shape: f32[32,32], index: 0, kind: input, shape index: {}]   ;;  %s1391_s1 = inlined_call_operand.hbm [shape: f32[32,128], index: 1, kind: input, shape index: {}]   ;;  %s1392_s2 = inlined_call_operand.hbm [shape: f32[1,128], index: 2, kind: input, shape index: {}]   ;;  %s1393_s3 = inlined_call_operand.hbm [shape: f32[32,128], index: 3, kind: output, shape index: {0}]   ;;  %s1394_s4 = inlined_call_operand.hbm [shape: bf16[32,128], index: 4, kind: output, shape index: {1}]   ;;  %s1395_s5 = inlined_call_operand.hbm [shape: s32[32,1], index: 5, kind: output, shape index: {2}]   ;;  %s1396_s6 = inlined_call_operand.hbm [shape: f32[8,128], index: 6, kind: output, shape index: {3}]   ;;  %s1397_s7 = inlined_call_operand.hbm [shape: f32[128,32], index: 7, kind: output, shape index: {4}]  }
   0x1   :  { %14 = vsyncpa [#allocation8], 0 }
   0x2   :  { %15 = vsyncpa [#allocation6], 0 }
   0x3   :  { %16 = vsyncpa [#allocation12], 0 }
   0x4   :  { %17 = vsyncpa [#allocation15], 0  ;;  %s1126_s24 = smov [#allocation7]   ;;  %s1127_s26 = smov [#allocation4]  }
   0x5   :  { %s39_s25 = sshll.u32 %s1126_s24, 4  ;;  %s27_s27 = sshll.u32 %s1127_s26, 4  ;;  %s40_s25 = int_to_ptr.vmem [resolvable:$true] %s39_s25  ;;  %s1179_s27 = int_to_ptr.vmem [resolvable:$true] %s27_s27 }
   0x6   :  { %s940_s30 = scalar_lea.hbm %s1391_s1, 512 }
   0x7   :  { %p941_p0 = scmp.ne.s32.totalorder %s1391_s1, %s940_s30  ;;  %p944_p1 = scmp.lt.u32.totalorder %s940_s30, %s1391_s1 }
   0x9   :  { %p946_p2 = pnand %p944_p1, %p941_p0 }
   0xb   :  { %949 = shalt.err (!%p946_p2)
}
   0xc   :  { %s950_s12 = scalar_lea.vmem %s40_s25, 512  ;;  %p955_p4 = scmp.lt.s32.totalorder %s40_s25, %s40_s25 }
   0xd   :  { %p951_p3 = scmp.ne.s32.totalorder %s40_s25, %s950_s12  ;;  %p956_p5 = scmp.lt.s32.totalorder %s950_s12, %s950_s12 }
   0xf   :  { %p957_p6 = por %p956_p5, %p955_p4 }
  0x11   :  { %p958_p7 = pnand %p957_p6, %p951_p3 }
  0x13   :  { %961 = shalt.err (!%p958_p7)
}
  0x14   :  { %s1128_s13 = smov 128   ;;  %s1129_s14 = smov 8  }
  0x15   :  { %45 = dma.hbm_to_vmem [thread:$0]  %s1391_s1, 512, %s40_s25, [#allocation8], %s1128_s13, %s1128_s13, %s1129_s14  }
  0x16   :  { %s962_s19 = scalar_lea.hbm %s1390_s0, 512 }
  0x17   :  { %p963_p8 = scmp.ne.s32.totalorder %s1390_s0, %s962_s19  ;;  %p966_p9 = scmp.lt.u32.totalorder %s962_s19, %s1390_s0 }
  0x19   :  { %p968_p10 = pnand %p966_p9, %p963_p8 }
  0x1b   :  { %971 = shalt.err (!%p968_p10)
}
  0x1c   :  { %s972_s24 = scalar_lea.vmem %s1179_s27, 512  ;;  %p977_p12 = scmp.lt.s32.totalorder %s1179_s27, %s1179_s27 }
  0x1d   :  { %p973_p11 = scmp.ne.s32.totalorder %s1179_s27, %s972_s24  ;;  %p978_p13 = scmp.lt.s32.totalorder %s972_s24, %s972_s24 }
  0x1f   :  { %p979_p0 = por %p978_p13, %p977_p12 }
  0x21   :  { %p980_p1 = pnand %p979_p0, %p973_p11 }
  0x23   :  { %983 = shalt.err (!%p980_p1)
}
  0x24   :  { %33 = dma.hbm_to_vmem [thread:$0]  %s1390_s0, 512, %s1179_s27, [#allocation5], %s1128_s13, %s1128_s13, %s1129_s14  }
  0x25   :  { %s1130_s26 = smov [#allocation9]   ;;  %s984_s8 = scalar_lea.hbm %s1392_s2, 16 }
  0x26   :  { %s52_s28 = sshll.u32 %s1130_s26, 4  ;;  %p985_p2 = scmp.ne.s32.totalorder %s1392_s2, %s984_s8  ;;  %s53_s28 = int_to_ptr.vmem [resolvable:$true] %s52_s28 }
  0x27   :  { %p988_p3 = scmp.lt.u32.totalorder %s984_s8, %s1392_s2 }
  0x29   :  { %p990_p4 = pnand %p988_p3, %p985_p2 }
  0x2b   :  { %993 = shalt.err (!%p990_p4)
}
  0x2c   :  { %s994_s15 = scalar_lea.vmem %s53_s28, 16  ;;  %s998_s0 = scalar_lea.vmem %s53_s28, 32 }
  0x2d   :  { %p995_p5 = scmp.ne.s32.totalorder %s53_s28, %s994_s15  ;;  %p999_p6 = scmp.lt.s32.totalorder %s53_s28, %s53_s28 }
  0x2e   :  { %p1000_p7 = scmp.lt.s32.totalorder %s998_s0, %s994_s15 }
  0x30   :  { %p1001_p8 = por %p1000_p7, %p999_p6 }
  0x32   :  { %p1002_p9 = pnand %p1001_p8, %p995_p5 }
  0x34   :  { %1005 = shalt.err (!%p1002_p9)
}
  0x35   :  { %55 = dma.hbm_to_vmem [thread:$0]  %s1392_s2, 16, %s53_s28, [#allocation8]  }
  0x36   :  { %1116 = dma.done.wait [#allocation5], 512  }
  0x37   :  { %1117 = vsyncadd [#allocation5], 4294966784 }
  0x38   :  { %1118 = dma.done.wait [#allocation8], 528  }
  0x39   :  { %1119 = vsyncadd [#allocation8], 4294966768  ;;  %vm78_vm0 = vcmask 261120   ;;  %v99_v0 = vld [vmem:[#allocation7] sm:$0xff]  ;;  %v100_v1 = vld [vmem:[#allocation7 + $0x8] sm:$0xff]  ;;  %v248_v41 = vlaneseq  ;;  %vm334_vm9 = vcmask 7168  }
  0x3a   :  { %v101_v2 = vld [vmem:[#allocation7 + $0x10] sm:$0xff]  ;;  %v907_v3 = vpack.c.bf16 %v100_v1, %v99_v0  ;;  %v102_v4 = vld [vmem:[#allocation7 + $0x18] sm:$0xff]  ;;  %v95_v5 = vld [vmem:[#allocation4] sm:$0xff]  ;;  %s1132_s2 = smov [#allocation11]   ;;  %s1133_s18 = smov [#allocation14]  }
  0x3b   :  { %v96_v6 = vld [vmem:[#allocation4 + $0x8] sm:$0xff]  ;;  %v911_v7 = vpack.c.bf16 %v102_v4, %v101_v2  ;;  %869 = vmatprep.mubr.msk.f32.mxu0 %vm78_vm0, %v95_v5  ;;  %v97_v9 = vld [vmem:[#allocation4 + $0x10] sm:$0xff]  ;;  %v98_v10 = vld [vmem:[#allocation4 + $0x18] sm:$0xff]  ;;  %v103_v11 = vmul.f32 %v95_v5, %v95_v5  ;;  %v1236_v42 = vand.u32 127, %v248_v41  ;;  %s727_s17 = sshll.u32 %s1132_s2, 4  ;;  %s756_s19 = sshll.u32 %s1133_s18, 4  ;;  %s728_s17 = int_to_ptr.vmem [resolvable:$true] %s727_s17  ;;  %s757_s19 = int_to_ptr.vmem [resolvable:$true] %s756_s19 }
  0x3c   :  { %v915_v8 = vpack.c.bf16 %v96_v6, %v95_v5  ;;  %v104_v12 = vmul.f32 %v96_v6, %v96_v6  ;;  %908 = vmatprep.subr.bf16.mxu0 %v907_v3  ;;  %v105_v13 = vmul.f32 %v97_v9, %v97_v9  ;;  %v106_v14 = vmul.f32 %v98_v10, %v98_v10  ;;  %v796_v27 = vld [vmem:[#allocation9] ss:$0 sm:$0xff]  ;;  %s1006_s20 = scalar_lea.vmem %s728_s17, 256  ;;  %p1011_p11 = scmp.lt.s32.totalorder %s728_s17, %s728_s17 }
  0x3d   :  { %910 = vmatpush3.bf16.msra.mxu0 %v907_v3  ;;  %v108_v15 = vsel %vm78_vm0, %v103_v11, 0.0  ;;  %v919_v16 = vpack.c.bf16 %v98_v10, %v97_v9  ;;  %v1131_v11 = vmov 0.0   ;;  %p1007_p10 = scmp.ne.s32.totalorder %s728_s17, %s1006_s20  ;;  %p1012_p12 = scmp.lt.s32.totalorder %s1006_s20, %s1006_s20 }
  0x3e   :  { %923 = vmatprep.subr.bf16.mxu1 %v915_v8  ;;  %912 = vmatprep.subr.bf16.mxu0 %v911_v7  ;;  %v114_v17 = vsel %vm78_vm0, %v105_v13, 0.0  ;;  %v111_v18 = vsel %vm78_vm0, %v104_v12, 0.0  ;;  %v117_v19 = vsel %vm78_vm0, %v106_v14, 0.0  ;;  %77 = vst [vmem:[#allocation2] sm:$0x1] %v1131_v11  ;;  %79 = vst.msk [vmem:[#allocation3] sm:$0xff] %vm78_vm0, %v1131_v11 }
  0x3f   :  { %109 = vadd.xlane.f32.xlu0 %v108_v15  ;;  %115 = vadd.xlane.f32.xlu1 %v114_v17  ;;  %80 = vst.msk [vmem:[#allocation3 + $0x8] sm:$0xff] %vm78_vm0, %v1131_v11  ;;  %81 = vst.msk [vmem:[#allocation3 + $0x10] sm:$0xff] %vm78_vm0, %v1131_v11  ;;  %p1013_p13 = por %p1012_p12, %p1011_p11 }
  0x40   :  { %925 = vmatpush3.bf16.msra.mxu1 %v915_v8  ;;  %82 = vst.msk [vmem:[#allocation3 + $0x18] sm:$0xff] %vm78_vm0, %v1131_v11  ;;  %83 = vst.msk [vmem:[#allocation3 + $0x20] sm:$0xff] %vm78_vm0, %v1131_v11 }
  0x41   :  { %924 = vmatprep.subr.bf16.mxu1 %v919_v16  ;;  %914 = vmatpush3.bf16.msra.mxu0 %v911_v7  ;;  %84 = vst.msk [vmem:[#allocation3 + $0x28] sm:$0xff] %vm78_vm0, %v1131_v11  ;;  %85 = vst.msk [vmem:[#allocation3 + $0x30] sm:$0xff] %vm78_vm0, %v1131_v11  ;;  %p1014_p0 = pnand %p1013_p13, %p1007_p10 }
  0x42   :  { %916 = vmatprep.subr.bf16.mxu0 %v915_v8  ;;  %86 = vst.msk [vmem:[#allocation3 + $0x38] sm:$0xff] %vm78_vm0, %v1131_v11  ;;  %87 = vst.msk [vmem:[#allocation3 + $0x40] sm:$0xff] %vm78_vm0, %v1131_v11 }
  0x43   :  { %112 = vadd.xlane.f32.xlu0 %v111_v18  ;;  %118 = vadd.xlane.f32.xlu1 %v117_v19  ;;  %88 = vst.msk [vmem:[#allocation3 + $0x48] sm:$0xff] %vm78_vm0, %v1131_v11  ;;  %89 = vst.msk [vmem:[#allocation3 + $0x50] sm:$0xff] %vm78_vm0, %v1131_v11 }
  0x44   :  { %926 = vmatpush3.bf16.msra.mxu1 %v919_v16  ;;  %870 = vmatmul.mubr.msk.f32.vlgmr.msra.gmra.mrb[0].mxu0 %vm78_vm0, %v96_v6  ;;  %90 = vst.msk [vmem:[#allocation3 + $0x58] sm:$0xff] %vm78_vm0, %v1131_v11  ;;  %91 = vst.msk [vmem:[#allocation3 + $0x60] sm:$0xff] %vm78_vm0, %v1131_v11 }
  0x45   :  { %872 = vmatprep.mubr.msk.f32.mxu0 %vm78_vm0, %v97_v9  ;;  %918 = vmatpush3.bf16.msra.mxu0 %v915_v8  ;;  %92 = vst.msk [vmem:[#allocation3 + $0x68] sm:$0xff] %vm78_vm0, %v1131_v11  ;;  %93 = vst.msk [vmem:[#allocation3 + $0x70] sm:$0xff] %vm78_vm0, %v1131_v11 }
  0x46   :  { %920 = vmatprep.subr.bf16.mxu0 %v919_v16  ;;  %94 = vst.msk [vmem:[#allocation3 + $0x78] sm:$0xff] %vm78_vm0, %v1131_v11 }
  0x48   :  { %873 = vmatmul.mubr.msk.f32.gmra.mrb[2].mxu0 %vm78_vm0, %v98_v10 }
  0x49   :  { %922 = vmatpush3.bf16.msra.mxu0 %v919_v16 }
  0xcc   :  { %v110_v20 = vpop.xlane.xlu0 %109  ;;  %v116_v21 = vpop.xlane.xlu1 %115 }
  0xd0   :  { %v113_v23 = vpop.xlane.xlu0 %112  ;;  %v119_v31 = vpop.xlane.xlu1 %118 }
 0x117   :  { %v871_v22 = vpop.f32.mrb[0].mxu0 }
 0x118   :  { %v218_v24 = vmul.f32 2.0, %v871_v22  ;;  %v198_v25 = vpop.f32.mrb[1].mxu0 }
 0x119   :  { %v217_v26 = vmul.f32 2.0, %v198_v25 }
 0x11a   :  { %v222_v28 = vsub.f32 %v113_v23, %v218_v24 }
 0x11b   :  { %v221_v29 = vsub.f32 %v110_v20, %v217_v26  ;;  %v874_v30 = vpop.f32.mrb[2].mxu0 }
 0x11c   :  { %v233_v32 = vadd.f32 %v796_v27, %v222_v28  ;;  %v220_v33 = vmul.f32 2.0, %v874_v30  ;;  %v208_v34 = vpop.f32.mrb[3].mxu0 }
 0x11d   :  { %v219_v35 = vmul.f32 2.0, %v208_v34  ;;  %v232_v36 = vadd.f32 %v796_v27, %v221_v29 }
 0x11e   :  { %237 = vst [vmem:[#allocation10 + $0x8] sm:$0xff] %v233_v32  ;;  %v224_v37 = vsub.f32 %v119_v31, %v220_v33  ;;  %242 = vmin.xlane.f32.xlu1 %v233_v32 }
 0x11f   :  { %v223_v38 = vsub.f32 %v116_v21, %v219_v35  ;;  %240 = vmin.xlane.f32.xlu0 %v232_v36  ;;  %236 = vst [vmem:[#allocation10] sm:$0xff] %v232_v36 }
 0x120   :  { %v235_v39 = vadd.f32 %v796_v27, %v224_v37 }
 0x121   :  { %v234_v40 = vadd.f32 %v796_v27, %v223_v38 }
 0x122   :  { %239 = vst [vmem:[#allocation10 + $0x18] sm:$0xff] %v235_v39  ;;  %246 = vmin.xlane.f32.xlu1 %v235_v39 }
 0x123   :  { %244 = vmin.xlane.f32.xlu0 %v234_v40  ;;  %238 = vst [vmem:[#allocation10 + $0x10] sm:$0xff] %v234_v40 }
 0x1ab   :  { %v243_v43 = vpop.xlane.xlu1 %242 }
 0x1ac   :  { %vm251_vm1 = vcmp.eq.f32.partialorder %v233_v32, %v243_v43  ;;  %v241_v44 = vpop.xlane.xlu0 %240 }
 0x1ad   :  { %v255_v45 = vsel %vm251_vm1, %v1236_v42, 128  ;;  %vm250_vm2 = vcmp.eq.f32.partialorder %v232_v36, %v241_v44 }
 0x1ae   :  { %v254_v46 = vsel %vm250_vm2, %v1236_v42, 128  ;;  %v273_v47 = vshra.s32 %v255_v45, 16  ;;  %v272_v59 = vand.u32 65535, %v255_v45 }
 0x1af   :  { %v247_v48 = vpop.xlane.xlu1 %246  ;;  %v259_v49 = vshra.s32 %v254_v46, 16  ;;  %v258_v60 = vand.u32 65535, %v254_v46 }
 0x1b0   :  { %vm253_vm3 = vcmp.eq.f32.partialorder %v235_v39, %v247_v48  ;;  %v245_v50 = vpop.xlane.xlu0 %244  ;;  %v275_v51 = vcvt.s32.f32 %v273_v47  ;;  %v274_v63 = vcvt.s32.f32 %v272_v59  ;;  %v371_v47 = vld [vmem:[#allocation2] sm:$0x1] }
 0x1b1   :  { %v257_v52 = vsel %vm253_vm3, %v1236_v42, 128  ;;  %vm252_vm4 = vcmp.eq.f32.partialorder %v234_v40, %v245_v50  ;;  %v261_v53 = vcvt.s32.f32 %v259_v49  ;;  %v260_v2 = vcvt.s32.f32 %v258_v60 }
 0x1b2   :  { %v256_v54 = vsel %vm252_vm4, %v1236_v42, 128  ;;  %276 = vmin.xlane.f32.xlu1 %v275_v51  ;;  %v301_v55 = vshra.s32 %v257_v52, 16  ;;  %v300_v61 = vand.u32 65535, %v257_v52 }
 0x1b3   :  { %262 = vmin.xlane.f32.xlu0 %v261_v53  ;;  %v287_v56 = vshra.s32 %v256_v54, 16  ;;  %v286_v0 = vand.u32 65535, %v256_v54 }
 0x1b4   :  { %v303_v57 = vcvt.s32.f32 %v301_v55  ;;  %v302_v6 = vcvt.s32.f32 %v300_v61 }
 0x1b5   :  { %v289_v58 = vcvt.s32.f32 %v287_v56  ;;  %v288_v8 = vcvt.s32.f32 %v286_v0 }
 0x1b6   :  { %304 = vmin.xlane.f32.xlu1 %v303_v57 }
 0x1b7   :  { %290 = vmin.xlane.f32.xlu0 %v289_v58 }
 0x23f   :  { %v277_v62 = vpop.xlane.xlu1 %276 }
 0x240   :  { %v263_v1 = vpop.xlane.xlu0 %262  ;;  %vm278_vm5 = vcmp.eq.f32.partialorder %v275_v51, %v277_v62  ;;  %v283_v12 = vcvt.f32.s32 %v277_v62 }
 0x241   :  { %v279_v3 = vsel %vm278_vm5, %v274_v63, inf  ;;  %vm264_vm6 = vcmp.eq.f32.partialorder %v261_v53, %v263_v1  ;;  %v269_v13 = vcvt.f32.s32 %v263_v1 }
 0x242   :  { %280 = vmin.xlane.f32.xlu1 %v279_v3  ;;  %v265_v4 = vsel %vm264_vm6, %v260_v2, inf  ;;  %v284_v15 = vshll.u32 %v283_v12, 16 }
 0x243   :  { %v305_v5 = vpop.xlane.xlu1 %304  ;;  %266 = vmin.xlane.f32.xlu0 %v265_v4  ;;  %v270_v19 = vshll.u32 %v269_v13, 16 }
 0x244   :  { %v291_v7 = vpop.xlane.xlu0 %290  ;;  %vm306_vm7 = vcmp.eq.f32.partialorder %v303_v57, %v305_v5  ;;  %v311_v16 = vcvt.f32.s32 %v305_v5 }
 0x245   :  { %v307_v9 = vsel %vm306_vm7, %v302_v6, inf  ;;  %vm292_vm8 = vcmp.eq.f32.partialorder %v289_v58, %v291_v7  ;;  %v297_v20 = vcvt.f32.s32 %v291_v7 }
 0x246   :  { %308 = vmin.xlane.f32.xlu1 %v307_v9  ;;  %v293_v10 = vsel %vm292_vm8, %v288_v8, inf  ;;  %v312_v25 = vshll.u32 %v311_v16, 16 }
 0x247   :  { %294 = vmin.xlane.f32.xlu0 %v293_v10  ;;  %v298_v28 = vshll.u32 %v297_v20, 16 }
 0x2cf   :  { %v281_v14 = vpop.xlane.xlu1 %280 }
 0x2d0   :  { %v282_v17 = vcvt.f32.s32 %v281_v14  ;;  %v267_v18 = vpop.xlane.xlu0 %266 }
 0x2d1   :  { %v268_v21 = vcvt.f32.s32 %v267_v18 }
 0x2d2   :  { %v285_v22 = vadd.s32 %v284_v15, %v282_v17 }
 0x2d3   :  { %v271_v23 = vadd.s32 %v270_v19, %v268_v21  ;;  %v309_v24 = vpop.xlane.xlu1 %308 }
 0x2d4   :  { %336 = vst.msk [vmem:[#allocation13 + $0x8] sm:$0xff] %vm334_vm9, %v285_v22  ;;  %v310_v26 = vcvt.f32.s32 %v309_v24  ;;  %v295_v27 = vpop.xlane.xlu0 %294  ;;  %vm340_vm10 = vcmp.eq.s32.totalorder %v1236_v42, %v285_v22 }
 0x2d5   :  { %335 = vst.msk [vmem:[#allocation13] sm:$0xff] %vm334_vm9, %v271_v23  ;;  %v296_v29 = vcvt.f32.s32 %v295_v27  ;;  %vm339_vm11 = vcmp.eq.s32.totalorder %v1236_v42, %v271_v23  ;;  %v798_v30 = vsel %vm340_vm10, 1.0, %v1131_v11 }
 0x2d6   :  { %v313_v31 = vadd.s32 %v312_v25, %v310_v26  ;;  %v797_v32 = vsel %vm339_vm11, 1.0, %v1131_v11 }
 0x2d7   :  { %v299_v33 = vadd.s32 %v298_v28, %v296_v29  ;;  %410 = vxpose.xlu0.b32.start [1/4] (short) %v797_v32, 128  ;;  %v827_v34 = vpack.c.bf16 %v798_v30, %v797_v32  ;;  %v372_v35 = vadd.f32 %v798_v30, %v797_v32 }
 0x2d8   :  { %338 = vst.msk [vmem:[#allocation13 + $0x18] sm:$0xff] %vm334_vm9, %v313_v31  ;;  %vm342_vm12 = vcmp.eq.s32.totalorder %v1236_v42, %v313_v31 }
 0x2d9   :  { %337 = vst.msk [vmem:[#allocation13 + $0x10] sm:$0xff] %vm334_vm9, %v299_v33  ;;  %828 = vst [vmem:[#allocation11] sm:$0xff] %v827_v34   ;;  %vm341_vm13 = vcmp.eq.s32.totalorder %v1236_v42, %v299_v33  ;;  %v800_v36 = vsel %vm342_vm12, 1.0, %v1131_v11 }
 0x2da   :  { %v799_v37 = vsel %vm341_vm13, 1.0, %v1131_v11 }
 0x2db   :  { %411 = vxpose.xlu0.b32.cont [2/4] (short) %v798_v30, 128  ;;  %v373_v38 = vadd.f32 %v799_v37, %v372_v35  ;;  %v830_v39 = vpack.c.bf16 %v800_v36, %v799_v37 }
 0x2dd   :  { %832 = vst [vmem:[#allocation11 + $0x8] sm:$0xff] %v830_v39   ;;  %v374_v40 = vadd.f32 %v800_v36, %v373_v38 }
 0x2df   :  { %412 = vxpose.xlu0.b32.cont [3/4] (short) %v799_v37, 128  ;;  %v375_v41 = vrot.slane %v374_v40, 4 }
 0x2e1   :  { %v376_v43 = vadd.f32 %v375_v41, %v374_v40 }
 0x2e3   :  { %413 = vxpose.xlu0.b32.end [4/4] (short) %v800_v36, 128  ;;  %v377_v44 = vrot.slane %v376_v43, 2 }
 0x2e5   :  { %v378_v45 = vadd.f32 %v377_v44, %v376_v43 }
 0x2e7   :  { %v379_v46 = vrot.slane %v378_v45, 1 }
 0x2e9   :  { %v380_v48 = vadd.f32 %v379_v46, %v378_v45 }
 0x2eb   :  { %v381_v49 = vadd.f32 %v380_v48, %v371_v47 }
 0x2ed   :  { %382 = vst [vmem:[#allocation2] sm:$0x1] %v381_v49 }
 0x2f4   :  { %v805_v50 = vld [vmem:[#allocation2] ss:$0 sm:$0xff] }
 0x2f5   :  { %393 = vst [vmem:[#allocation14] sm:$0xff] %v805_v50 }
 0x357   :  { %v426_v42 = vpop.trf.xlu0 }
 0x358   :  { %883 = vmatprep.mubr.msk.f32.mxu0 %vm78_vm0, %v426_v42 }
 0x35b   :  { %v427_v51 = vpop.trf.xlu0 }
 0x35c   :  { %884 = vmatmul.mubr.msk.f32.vlgmr.msra.gmra.mrb[4].mxu0 %vm78_vm0, %v427_v51 }
 0x35f   :  { %v428_v52 = vpop.trf.xlu0 }
 0x360   :  { %886 = vmatprep.mubr.msk.f32.mxu0 %vm78_vm0, %v428_v52 }
 0x363   :  { %v429_v53 = vpop.trf.xlu0 }
 0x364   :  { %887 = vmatmul.mubr.msk.f32.gmra.mrb[6].mxu0 %vm78_vm0, %v429_v53 }
 0x367   :  { %v430_v54 = vpop.trf.xlu0 }
 0x368   :  { %889 = vmatprep.mubr.msk.f32.mxu0 %vm78_vm0, %v430_v54 }
 0x36b   :  { %v431_v55 = vpop.trf.xlu0 }
 0x36c   :  { %890 = vmatmul.mubr.msk.f32.gmra.mrb[8].mxu0 %vm78_vm0, %v431_v55 }
 0x36f   :  { %v432_v56 = vpop.trf.xlu0 }
 0x370   :  { %892 = vmatprep.mubr.msk.f32.mxu1 %vm78_vm0, %v432_v56 }
 0x373   :  { %v433_v57 = vpop.trf.xlu0 }
 0x374   :  { %893 = vmatmul.mubr.msk.f32.vlgmr.msra.gmra.mrb[0].mxu1 %vm78_vm0, %v433_v57 }
 0x377   :  { %v434_v58 = vpop.trf.xlu0 }
 0x378   :  { %895 = vmatprep.mubr.msk.f32.mxu1 %vm78_vm0, %v434_v58 }
 0x37b   :  { %v435_v59 = vpop.trf.xlu0 }
 0x37c   :  { %896 = vmatmul.mubr.msk.f32.gmra.mrb[2].mxu1 %vm78_vm0, %v435_v59 }
 0x37f   :  { %v436_v60 = vpop.trf.xlu0 }
 0x380   :  { %898 = vmatprep.mubr.msk.f32.mxu1 %vm78_vm0, %v436_v60 }
 0x383   :  { %v437_v61 = vpop.trf.xlu0 }
 0x384   :  { %899 = vmatmul.mubr.msk.f32.gmra.mrb[4].mxu1 %vm78_vm0, %v437_v61 }
 0x387   :  { %v438_v62 = vpop.trf.xlu0 }
 0x388   :  { %901 = vmatprep.mubr.msk.f32.mxu1 %vm78_vm0, %v438_v62 }
 0x38b   :  { %v439_v63 = vpop.trf.xlu0 }
 0x38c   :  { %902 = vmatmul.mubr.msk.f32.gmra.mrb[6].mxu1 %vm78_vm0, %v439_v63 }
 0x38f   :  { %v440_v0 = vpop.trf.xlu0 }
 0x390   :  { %904 = vmatprep.mubr.msk.f32.mxu1 %vm78_vm0, %v440_v0 }
 0x393   :  { %v441_v1 = vpop.trf.xlu0 }
 0x394   :  { %905 = vmatmul.mubr.msk.f32.gmra.mrb[8].mxu1 %vm78_vm0, %v441_v1 }
 0x395   :  { %1017 = shalt.err (!%p1014_p0)
}
 0x396   :  { %s1018_s23 = scalar_lea.hbm %s1394_s4, 256 }
 0x397   :  { %p1019_p1 = scmp.ne.s32.totalorder %s1394_s4, %s1018_s23  ;;  %p1022_p2 = scmp.lt.u32.totalorder %s1018_s23, %s1394_s4 }
 0x399   :  { %p1024_p3 = pnand %p1022_p2, %p1019_p1 }
 0x39b   :  { %1027 = shalt.err (!%p1024_p3)
}
 0x39c   :  { %s1134_s28 = smov 64   ;;  %s1135_s29 = smov 4  }
 0x39d   :  { %733 = dma.vmem_to_hbm [thread:$0]  %s728_s17, 256, %s1394_s4, [#allocation12], %s1134_s28, %s1134_s28, %s1135_s29  }
 0x39e   :  { %s1028_s9 = scalar_lea.vmem %s757_s19, 128  ;;  %p1033_p5 = scmp.lt.s32.totalorder %s757_s19, %s757_s19 }
 0x39f   :  { %p1029_p4 = scmp.ne.s32.totalorder %s757_s19, %s1028_s9  ;;  %p1034_p6 = scmp.lt.s32.totalorder %s1028_s9, %s1028_s9 }
 0x3a1   :  { %p1035_p7 = por %p1034_p6, %p1033_p5 }
 0x3a3   :  { %p1036_p8 = pnand %p1035_p7, %p1029_p4 }
 0x3a5   :  { %1039 = shalt.err (!%p1036_p8)
}
 0x3a6   :  { %s1040_s12 = scalar_lea.hbm %s1396_s6, 128 }
 0x3a7   :  { %p1041_p9 = scmp.ne.s32.totalorder %s1396_s6, %s1040_s12  ;;  %p1044_p10 = scmp.lt.u32.totalorder %s1040_s12, %s1396_s6 }
 0x3a9   :  { %p1046_p11 = pnand %p1044_p10, %p1041_p9 }
 0x3ab   :  { %1049 = shalt.err (!%p1046_p11)
}
 0x3ac   :  { %759 = dma.vmem_to_hbm [thread:$0]  %s757_s19, 128, %s1396_s6, [#allocation15]  }
 0x3ad   :  { %s1136_s17 = smov [#allocation10]   ;;  %s1137_s20 = smov [#allocation13]  }
 0x3ae   :  { %s711_s18 = sshll.u32 %s1136_s17, 4  ;;  %s743_s21 = sshll.u32 %s1137_s20, 4  ;;  %s712_s18 = int_to_ptr.vmem [resolvable:$true] %s711_s18  ;;  %s1306_s21 = int_to_ptr.vmem [resolvable:$true] %s743_s21 }
 0x3af   :  { %s1050_s22 = scalar_lea.vmem %s712_s18, 512  ;;  %p1055_p13 = scmp.lt.s32.totalorder %s712_s18, %s712_s18 }
 0x3b0   :  { %p1051_p12 = scmp.ne.s32.totalorder %s712_s18, %s1050_s22  ;;  %p1056_p0 = scmp.lt.s32.totalorder %s1050_s22, %s1050_s22 }
 0x3b2   :  { %p1057_p1 = por %p1056_p0, %p1055_p13 }
 0x3b4   :  { %p1058_p2 = pnand %p1057_p1, %p1051_p12 }
 0x3b6   :  { %1061 = shalt.err (!%p1058_p2)
}
 0x3b7   :  { %s1062_s1 = scalar_lea.hbm %s1393_s3, 512 }
 0x3b8   :  { %p1063_p3 = scmp.ne.s32.totalorder %s1393_s3, %s1062_s1  ;;  %p1066_p4 = scmp.lt.u32.totalorder %s1062_s1, %s1393_s3 }
 0x3ba   :  { %p1068_p5 = pnand %p1066_p4, %p1063_p3 }
 0x3bc   :  { %1071 = shalt.err (!%p1068_p5)
}
 0x3bd   :  { %717 = dma.vmem_to_hbm [thread:$0]  %s712_s18, 512, %s1393_s3, [#allocation6], %s1128_s13, %s1128_s13, %s1129_s14  }
 0x3be   :  { %s1072_s30 = scalar_lea.vmem %s1306_s21, 512  ;;  %p1077_p7 = scmp.lt.s32.totalorder %s1306_s21, %s1306_s21 }
 0x3bf   :  { %p1073_p6 = scmp.ne.s32.totalorder %s1306_s21, %s1072_s30  ;;  %p1078_p8 = scmp.lt.s32.totalorder %s1072_s30, %s1072_s30 }
 0x3c1   :  { %p1079_p9 = por %p1078_p8, %p1077_p7 }
 0x3c3   :  { %p1080_p10 = pnand %p1079_p9, %p1073_p6 }
 0x3c5   :  { %1083 = shalt.err (!%p1080_p10)
}
 0x3c6   :  { %s1084_s10 = scalar_lea.hbm %s1395_s5, 512 }
 0x3c7   :  { %p1085_p11 = scmp.ne.s32.totalorder %s1395_s5, %s1084_s10  ;;  %p1088_p12 = scmp.lt.u32.totalorder %s1084_s10, %s1395_s5 }
 0x3c9   :  { %p1090_p13 = pnand %p1088_p12, %p1085_p11 }
 0x3cb   :  { %1093 = shalt.err (!%p1090_p13)
}
 0x3cc   :  { %749 = dma.vmem_to_hbm [thread:$0]  %s1306_s21, 512, %s1395_s5, [#allocation12], %s1128_s13, %s1128_s13, %s1129_s14   ;;  %v395_v2 = vld [vmem:[#allocation3 + $0x8] sm:$0xff]  ;;  %v394_v3 = vld [vmem:[#allocation3] sm:$0xff]  ;;  %v397_v8 = vld [vmem:[#allocation3 + $0x18] sm:$0xff] }
 0x3cd   :  { %v396_v9 = vld [vmem:[#allocation3 + $0x10] sm:$0xff]  ;;  %v399_v16 = vld [vmem:[#allocation3 + $0x28] sm:$0xff]  ;;  %v398_v17 = vld [vmem:[#allocation3 + $0x20] sm:$0xff]  ;;  %s1138_s5 = smov [#allocation16]  }
 0x3ce   :  { %v401_v24 = vld [vmem:[#allocation3 + $0x38] sm:$0xff]  ;;  %v400_v25 = vld [vmem:[#allocation3 + $0x30] sm:$0xff]  ;;  %v403_v32 = vld [vmem:[#allocation3 + $0x48] sm:$0xff]  ;;  %s765_s16 = sshll.u32 %s1138_s5, 4  ;;  %s766_s16 = int_to_ptr.vmem [resolvable:$true] %s765_s16 }
 0x3cf   :  { %v402_v33 = vld [vmem:[#allocation3 + $0x40] sm:$0xff]  ;;  %v405_v40 = vld [vmem:[#allocation3 + $0x58] sm:$0xff]  ;;  %v404_v41 = vld [vmem:[#allocation3 + $0x50] sm:$0xff]  ;;  %s1094_s4 = scalar_lea.vmem %s766_s16, 2048  ;;  %p1099_p1 = scmp.lt.s32.totalorder %s766_s16, %s766_s16 }
 0x3d0   :  { %v407_v49 = vld [vmem:[#allocation3 + $0x68] sm:$0xff]  ;;  %v406_v50 = vld [vmem:[#allocation3 + $0x60] sm:$0xff]  ;;  %v409_v56 = vld [vmem:[#allocation3 + $0x78] sm:$0xff]  ;;  %p1095_p0 = scmp.ne.s32.totalorder %s766_s16, %s1094_s4  ;;  %p1100_p2 = scmp.lt.s32.totalorder %s1094_s4, %s1094_s4 }
 0x3d1   :  { %v408_v57 = vld [vmem:[#allocation3 + $0x70] sm:$0xff] }
 0x3d2   :  { %p1101_p3 = por %p1100_p2, %p1099_p1 }
 0x3d4   :  { %p1102_p4 = pnand %p1101_p3, %p1095_p0 }
 0x42f   :  { %v885_v4 = vpop.f32.mrb[4].mxu0 }
 0x430   :  { %v636_v5 = vadd.f32 %v885_v4, %v395_v2  ;;  %v556_v6 = vpop.f32.mrb[5].mxu0 }
 0x431   :  { %v635_v7 = vadd.f32 %v556_v6, %v394_v3 }
 0x432   :  { %652 = vst.msk [vmem:[#allocation3 + $0x8] sm:$0xff] %vm78_vm0, %v636_v5 }
 0x433   :  { %651 = vst.msk [vmem:[#allocation3] sm:$0xff] %vm78_vm0, %v635_v7 }
 0x437   :  { %v888_v10 = vpop.f32.mrb[6].mxu0 }
 0x438   :  { %v638_v11 = vadd.f32 %v888_v10, %v397_v8  ;;  %v566_v12 = vpop.f32.mrb[7].mxu0 }
 0x439   :  { %v671_v13 = vld [vmem:[#allocation3 + $0x8] sm:$0xff]  ;;  %v637_v14 = vadd.f32 %v566_v12, %v396_v9 }
 0x43a   :  { %687 = vst.msk [vmem:[#allocation16 + $0x8] sm:$0xff] %vm78_vm0, %v671_v13  ;;  %v670_v15 = vld [vmem:[#allocation3] sm:$0xff]  ;;  %654 = vst.msk [vmem:[#allocation3 + $0x18] sm:$0xff] %vm78_vm0, %v638_v11 }
 0x43b   :  { %686 = vst.msk [vmem:[#allocation16] sm:$0xff] %vm78_vm0, %v670_v15  ;;  %653 = vst.msk [vmem:[#allocation3 + $0x10] sm:$0xff] %vm78_vm0, %v637_v14 }
 0x43f   :  { %v891_v18 = vpop.f32.mrb[8].mxu0 }
 0x440   :  { %v640_v19 = vadd.f32 %v891_v18, %v399_v16  ;;  %v576_v20 = vpop.f32.mrb[9].mxu0 }
 0x441   :  { %v673_v21 = vld [vmem:[#allocation3 + $0x18] sm:$0xff]  ;;  %v639_v22 = vadd.f32 %v576_v20, %v398_v17 }
 0x442   :  { %689 = vst.msk [vmem:[#allocation16 + $0x18] sm:$0xff] %vm78_vm0, %v673_v21  ;;  %v672_v23 = vld [vmem:[#allocation3 + $0x10] sm:$0xff]  ;;  %656 = vst.msk [vmem:[#allocation3 + $0x28] sm:$0xff] %vm78_vm0, %v640_v19 }
 0x443   :  { %688 = vst.msk [vmem:[#allocation16 + $0x10] sm:$0xff] %vm78_vm0, %v672_v23  ;;  %655 = vst.msk [vmem:[#allocation3 + $0x20] sm:$0xff] %vm78_vm0, %v639_v22 }
 0x447   :  { %v894_v26 = vpop.f32.mrb[0].mxu1 }
 0x448   :  { %v642_v27 = vadd.f32 %v894_v26, %v401_v24  ;;  %v586_v28 = vpop.f32.mrb[1].mxu1 }
 0x449   :  { %v675_v29 = vld [vmem:[#allocation3 + $0x28] sm:$0xff]  ;;  %v641_v30 = vadd.f32 %v586_v28, %v400_v25 }
 0x44a   :  { %691 = vst.msk [vmem:[#allocation16 + $0x28] sm:$0xff] %vm78_vm0, %v675_v29  ;;  %v674_v31 = vld [vmem:[#allocation3 + $0x20] sm:$0xff]  ;;  %658 = vst.msk [vmem:[#allocation3 + $0x38] sm:$0xff] %vm78_vm0, %v642_v27 }
 0x44b   :  { %690 = vst.msk [vmem:[#allocation16 + $0x20] sm:$0xff] %vm78_vm0, %v674_v31  ;;  %657 = vst.msk [vmem:[#allocation3 + $0x30] sm:$0xff] %vm78_vm0, %v641_v30 }
 0x44f   :  { %v897_v34 = vpop.f32.mrb[2].mxu1 }
 0x450   :  { %v644_v35 = vadd.f32 %v897_v34, %v403_v32  ;;  %v596_v36 = vpop.f32.mrb[3].mxu1 }
 0x451   :  { %v677_v37 = vld [vmem:[#allocation3 + $0x38] sm:$0xff]  ;;  %v643_v38 = vadd.f32 %v596_v36, %v402_v33 }
 0x452   :  { %693 = vst.msk [vmem:[#allocation16 + $0x38] sm:$0xff] %vm78_vm0, %v677_v37  ;;  %v676_v39 = vld [vmem:[#allocation3 + $0x30] sm:$0xff]  ;;  %660 = vst.msk [vmem:[#allocation3 + $0x48] sm:$0xff] %vm78_vm0, %v644_v35 }
 0x453   :  { %692 = vst.msk [vmem:[#allocation16 + $0x30] sm:$0xff] %vm78_vm0, %v676_v39  ;;  %659 = vst.msk [vmem:[#allocation3 + $0x40] sm:$0xff] %vm78_vm0, %v643_v38 }
 0x457   :  { %v900_v43 = vpop.f32.mrb[4].mxu1 }
 0x458   :  { %v646_v44 = vadd.f32 %v900_v43, %v405_v40  ;;  %v606_v45 = vpop.f32.mrb[5].mxu1 }
 0x459   :  { %v679_v46 = vld [vmem:[#allocation3 + $0x48] sm:$0xff]  ;;  %v645_v47 = vadd.f32 %v606_v45, %v404_v41 }
 0x45a   :  { %695 = vst.msk [vmem:[#allocation16 + $0x48] sm:$0xff] %vm78_vm0, %v679_v46  ;;  %v678_v48 = vld [vmem:[#allocation3 + $0x40] sm:$0xff]  ;;  %662 = vst.msk [vmem:[#allocation3 + $0x58] sm:$0xff] %vm78_vm0, %v646_v44 }
 0x45b   :  { %694 = vst.msk [vmem:[#allocation16 + $0x40] sm:$0xff] %vm78_vm0, %v678_v48  ;;  %661 = vst.msk [vmem:[#allocation3 + $0x50] sm:$0xff] %vm78_vm0, %v645_v47 }
 0x45f   :  { %v903_v42 = vpop.f32.mrb[6].mxu1 }
 0x460   :  { %v648_v51 = vadd.f32 %v903_v42, %v407_v49  ;;  %v616_v52 = vpop.f32.mrb[7].mxu1 }
 0x461   :  { %v681_v53 = vld [vmem:[#allocation3 + $0x58] sm:$0xff]  ;;  %v647_v54 = vadd.f32 %v616_v52, %v406_v50 }
 0x462   :  { %697 = vst.msk [vmem:[#allocation16 + $0x58] sm:$0xff] %vm78_vm0, %v681_v53  ;;  %v680_v55 = vld [vmem:[#allocation3 + $0x50] sm:$0xff]  ;;  %664 = vst.msk [vmem:[#allocation3 + $0x68] sm:$0xff] %vm78_vm0, %v648_v51 }
 0x463   :  { %696 = vst.msk [vmem:[#allocation16 + $0x50] sm:$0xff] %vm78_vm0, %v680_v55  ;;  %663 = vst.msk [vmem:[#allocation3 + $0x60] sm:$0xff] %vm78_vm0, %v647_v54 }
 0x467   :  { %v906_v58 = vpop.f32.mrb[8].mxu1 }
 0x468   :  { %v650_v59 = vadd.f32 %v906_v58, %v409_v56  ;;  %v626_v60 = vpop.f32.mrb[9].mxu1 }
 0x469   :  { %v683_v61 = vld [vmem:[#allocation3 + $0x68] sm:$0xff]  ;;  %v649_v62 = vadd.f32 %v626_v60, %v408_v57 }
 0x46a   :  { %699 = vst.msk [vmem:[#allocation16 + $0x68] sm:$0xff] %vm78_vm0, %v683_v61  ;;  %v682_v63 = vld [vmem:[#allocation3 + $0x60] sm:$0xff]  ;;  %666 = vst.msk [vmem:[#allocation3 + $0x78] sm:$0xff] %vm78_vm0, %v650_v59 }
 0x46b   :  { %698 = vst.msk [vmem:[#allocation16 + $0x60] sm:$0xff] %vm78_vm0, %v682_v63  ;;  %665 = vst.msk [vmem:[#allocation3 + $0x70] sm:$0xff] %vm78_vm0, %v649_v62 }
 0x471   :  { %v685_v0 = vld [vmem:[#allocation3 + $0x78] sm:$0xff] }
 0x472   :  { %701 = vst.msk [vmem:[#allocation16 + $0x78] sm:$0xff] %vm78_vm0, %v685_v0  ;;  %v684_v1 = vld [vmem:[#allocation3 + $0x70] sm:$0xff] }
 0x473   :  { %700 = vst.msk [vmem:[#allocation16 + $0x70] sm:$0xff] %vm78_vm0, %v684_v1 }
 0x474   :  { %1105 = shalt.err (!%p1102_p4)
}
 0x475   :  { %s1106_s18 = scalar_lea.hbm %s1397_s7, 2048 }
 0x476   :  { %p1107_p5 = scmp.ne.s32.totalorder %s1397_s7, %s1106_s18  ;;  %p1110_p6 = scmp.lt.u32.totalorder %s1106_s18, %s1397_s7 }
 0x478   :  { %p1112_p7 = pnand %p1110_p6, %p1107_p5 }
 0x47a   :  { %1115 = shalt.err (!%p1112_p7)
}
 0x47b   :  { %771 = dma.vmem_to_hbm [thread:$0]  %s766_s16, 2048, %s1397_s7, [#allocation15], %s1128_s13, %s1128_s13, %s1129_s14  }
 0x47c   :  { %1120 = dma.done.wait [#allocation6], 512  }
 0x47d   :  { %1121 = vsyncadd [#allocation6], 4294966784 }
 0x47e   :  { %1122 = dma.done.wait [#allocation12], 768  }
 0x47f   :  { %1123 = vsyncadd [#allocation12], 4294966528 }
 0x480   :  { %1124 = dma.done.wait [#allocation15], 2176  }
 0x481   :  { %1125 = vsyncadd [#allocation15], 4294965120 }
 0x482   :  { %787 = vsyncpa [#allocation5], 1 }
 0x483   :  { %788 = vsyncpa [#allocation8], 1 }
 0x484   :  { %789 = vsyncpa [#allocation6], 1 }
 0x485   :  { %790 = vsyncpa [#allocation12], 1 }
 0x486   :  { %791 = vsyncpa [#allocation15], 1 }

</bundles_post_ra>
